<compile_context>
chip_gen: v7x
topology: tpu7x:2x2x1
jax: 0.10.0
libtpu: 0.0.40
codegen_flags: <defaults>
</compile_context>

<pallas_src>
import functools
import math

import jax
import jax.numpy as jnp
from jax import lax
from jax.experimental import pallas as pl
from jax.experimental.pallas import tpu as pltpu


def _nbytes(shape, dtype):
    return math.prod(shape) * jnp.dtype(dtype).itemsize


# ----------------------------------------------------------------------------
# Per-layer bidirectional LSTM kernel.
#   grid = (2,)  : grid step d = direction (0 = forward, 1 = backward)
#   x_ref        : (P, S, B, Din)  shared input, P feature parts (P=1 embedding,
#                                  P=2 = [fwd hiddens, bwd hiddens] of prev layer)
#   w_ih_ref     : (P, Din, 4H)    this direction's input weights  (bf16)
#   w_hh_ref     : (H, 4H)         this direction's recurrent weights (bf16)
#   b_ref        : (1, 4H)         this direction's bias (b_ih + b_hh, f32)
#   [fc_w_ref]   : (H, n_out)      this direction's half of the Linear head (bf16)
#   out_ref      : (S, B, H) bf16  (sequence output)  OR  (B, n_out) f32 (fc partial)
#   xw_ref       : (S, B, 4H) f32  VMEM scratch holding the hoisted input projection
# ----------------------------------------------------------------------------
def _make_bilstm_kernel(hidden_dim, seq_len, n_parts, fuse_fc, unroll):
    H, S, P = hidden_dim, seq_len, n_parts

    def kernel(*refs):
        if fuse_fc:
            x_ref, w_ih_ref, w_hh_ref, b_ref, fc_w_ref, out_ref, xw_ref = refs
        else:
            x_ref, w_ih_ref, w_hh_ref, b_ref, out_ref, xw_ref = refs

        B = x_ref.shape[2]
        din = x_ref.shape[3]
        is_bwd = pl.program_id(0) == 1

        # ---- Hoisted input projection: one big MXU matmul (M = S*B) per feature
        #      part, dense weights (no structural zeros).  Bias folded in once. ----
        proj = jnp.dot(x_ref[0].reshape(S * B, din), w_ih_ref[0],
                       preferred_element_type=jnp.float32)
        for p in range(1, P):
            proj = proj + jnp.dot(x_ref[p].reshape(S * B, din), w_ih_ref[p],
                                  preferred_element_type=jnp.float32)
        xw_ref[...] = proj.reshape(S, B, 4 * H) + b_ref[...]          # (S, B, 4H) f32

        w_hh = w_hh_ref[...]                                          # (H, 4H) bf16

        def step(t, carry):
            h, c = carry
            tt = jnp.where(is_bwd, S - 1 - t, t)                      # time index
            gates = xw_ref[tt] + jnp.dot(h.astype(w_hh.dtype), w_hh,
                                         preferred_element_type=jnp.float32)
            # gate column order [i, f, o | g]: one wide sigmoid slab + one tanh slab
            sig = jax.nn.sigmoid(gates[:, :3 * H])
            i_g = sig[:, 0 * H:1 * H]
            f_g = sig[:, 1 * H:2 * H]
            o_g = sig[:, 2 * H:3 * H]
            g_g = jnp.tanh(gates[:, 3 * H:])
            c = f_g * c + i_g * g_g
            h = o_g * jnp.tanh(c)
            if not fuse_fc:
                out_ref[tt] = h.astype(out_ref.dtype)                 # bf16 store
            return h, c

        z = jnp.zeros((B, H), jnp.float32)
        h, _ = lax.fori_loop(0, S, step, (z, z), unroll=unroll)

        if fuse_fc:
            # Last layer: no sequence output; emit this direction's partial logits.
            out_ref[...] = jnp.dot(h.astype(fc_w_ref.dtype), fc_w_ref[...],
                                   preferred_element_type=jnp.float32)

    return kernel


def bilstm_layer(x, w_ih, w_hh, b, *, hidden_dim, fc_w=None, unroll=8):
    """One bidirectional LSTM layer.

    x: (P, S, B, Din) bf16.  Returns (2, S, B, H) bf16 (sequence), or, if fc_w is
    given (last layer), (2, B, n_out) f32 per-direction partial logits.
    """
    P, S, B, Din = x.shape
    H = hidden_dim
    fuse_fc = fc_w is not None

    in_specs = [
        pl.BlockSpec((P, S, B, Din), lambda d: (0, 0, 0, 0)),            # shared x
        pl.BlockSpec((None, P, Din, 4 * H), lambda d: (d, 0, 0, 0)),     # W_ih[d]
        pl.BlockSpec((None, H, 4 * H), lambda d: (d, 0, 0)),             # W_hh[d]
        pl.BlockSpec((None, 1, 4 * H), lambda d: (d, 0, 0)),             # bias[d]
    ]
    args = [x, w_ih, w_hh, b]
    io_bytes = (_nbytes((P, S, B, Din), x.dtype)
                + _nbytes((P, Din, 4 * H), w_ih.dtype)
                + _nbytes((H, 4 * H), w_hh.dtype)
                + _nbytes((1, 4 * H), b.dtype))

    if fuse_fc:
        n_out = fc_w.shape[-1]
        in_specs.append(pl.BlockSpec((None, H, n_out), lambda d: (d, 0, 0)))
        args.append(fc_w)
        out_shape = jax.ShapeDtypeStruct((2, B, n_out), jnp.float32)
        out_spec = pl.BlockSpec((None, B, n_out), lambda d: (d, 0, 0))
        io_bytes += _nbytes((H, n_out), fc_w.dtype) + _nbytes((B, n_out), jnp.float32)
    else:
        out_shape = jax.ShapeDtypeStruct((2, S, B, H), jnp.bfloat16)
        out_spec = pl.BlockSpec((None, S, B, H), lambda d: (d, 0, 0, 0))
        io_bytes += _nbytes((S, B, H), jnp.bfloat16)

    scratch_bytes = _nbytes((S, B, 4 * H), jnp.float32)
    vmem_need = 2 * io_bytes + scratch_bytes + (2 << 20)                 # 2x: double buffering
    vmem_limit = int(min(max(vmem_need, 32 << 20), 64 << 20))            # 64 MiB cap: v7x-safe
    # TODO(synk): for very long sequences (vmem_need > 64 MiB) the time axis should
    # additionally be chunked with a second grid axis; not needed at these sizes.

    grid_spec = pltpu.PrefetchScalarGridSpec(
        num_scalar_prefetch=0,
        grid=(2,),                                   # one grid step per direction
        in_specs=in_specs,
        out_specs=out_spec,
        scratch_shapes=[pltpu.VMEM((S, B, 4 * H), jnp.float32)],
    )
    return pl.pallas_call(
        _make_bilstm_kernel(H, S, P, fuse_fc, min(unroll, S)),
        grid_spec=grid_spec,
        out_shape=out_shape,
        compiler_params=pltpu.CompilerParams(
            dimension_semantics=("parallel",),       # fwd/bwd on separate TCs on v7x
            vmem_limit_bytes=vmem_limit),
    )(*args)


# ----------------------------------------------------------------------------
# Full model forward (matches RNN.forward semantics, inference mode)
# ----------------------------------------------------------------------------
@functools.partial(jax.jit, static_argnames=("hidden_dim",))
def rnn_forward(tokens, params, *, hidden_dim):
    S, B = tokens.shape
    b_pad = max(8, ((B + 7) // 8) * 8)               # pad batch to the f32 sublane count
    if b_pad != B:
        tokens = jnp.pad(tokens, ((0, 0), (0, b_pad - B)))

    # Embedding lookup (tiny gather, left to XLA) + dropout (identity at inference).
    emb = jnp.take(params["embedding"], tokens, axis=0)        # (S, b_pad, E) f32
    # TODO(synk): dropout is identity (inference); stochastic dropout not implemented.

    x = emb.astype(jnp.bfloat16)[None]                         # (1, S, b_pad, E)
    for layer in params["lstm_layers"][:-1]:
        x = bilstm_layer(x, layer["w_ih"], layer["w_hh"], layer["b"],
                         hidden_dim=hidden_dim)                # (2, S, b_pad, H) bf16

    last = params["lstm_layers"][-1]
    partials = bilstm_layer(x, last["w_ih"], last["w_hh"], last["b"],
                            hidden_dim=hidden_dim,
                            fc_w=params["fc_w"])               # (2, b_pad, n_pad) f32

    out_dim = params["fc_b"].shape[-1]                         # static at trace time
    logits = partials[0] + partials[1]                         # combine fwd/bwd fc halves
    return logits[:B, :out_dim] + params["fc_b"]


# ----------------------------------------------------------------------------
# Deterministic parameter init (shapes match nn.Embedding / nn.LSTM / nn.Linear).
# Per layer & direction:
#   w_ih : (P, Din, 4H)  = W_ih.T split into P input-feature parts, gate-reordered
#   w_hh : (H, 4H)       = W_hh.T, gate-reordered
#   b    : (1, 4H)       = b_ih + b_hh, gate-reordered
# Gate order is re-packed from PyTorch's [i, f, g, o] to [i, f, o, g].
# fc: fc_w.T padded to a 128-lane multiple and split into fwd/bwd halves (2, H, n_pad).
# ----------------------------------------------------------------------------
def init_params(key, vocab_size, embedding_dim, hidden_dim, output_dim, n_layers,
                weight_dtype=jnp.bfloat16):
    H = hidden_dim
    k = 1.0 / math.sqrt(H)
    gate_perm = jnp.concatenate([jnp.arange(0, 2 * H),            # i, f
                                 jnp.arange(3 * H, 4 * H),        # o
                                 jnp.arange(2 * H, 3 * H)])       # g

    keys = iter(jax.random.split(key, 1 + n_layers * 8 + 2))

    params = {
        "embedding": jax.random.normal(next(keys), (vocab_size, embedding_dim),
                                       jnp.float32),
        "lstm_layers": [],
    }
    for layer_idx in range(n_layers):
        in_dim = embedding_dim if layer_idx == 0 else 2 * H
        n_parts = 1 if layer_idx == 0 else 2
        part_dim = in_dim // n_parts
        w_ih_dirs, w_hh_dirs, b_dirs = [], [], []
        for _ in range(2):                                  # forward, then backward
            w_ih = jax.random.uniform(next(keys), (4 * H, in_dim), jnp.float32, -k, k)
            w_hh = jax.random.uniform(next(keys), (4 * H, H), jnp.float32, -k, k)
            b_ih = jax.random.uniform(next(keys), (4 * H,), jnp.float32, -k, k)
            b_hh = jax.random.uniform(next(keys), (4 * H,), jnp.float32, -k, k)
            w_ih_t = w_ih.T[:, gate_perm]                   # (in_dim, 4H)
            w_hh_t = w_hh.T[:, gate_perm]                   # (H, 4H)
            bias = (b_ih + b_hh)[gate_perm]                 # (4H,)
            w_ih_dirs.append(w_ih_t.reshape(n_parts, part_dim, 4 * H))
            w_hh_dirs.append(w_hh_t)
            b_dirs.append(bias.reshape(1, 4 * H))
        params["lstm_layers"].append({
            "w_ih": jnp.stack(w_ih_dirs).astype(weight_dtype),   # (2, P, Din, 4H)
            "w_hh": jnp.stack(w_hh_dirs).astype(weight_dtype),   # (2, H, 4H)
            "b": jnp.stack(b_dirs).astype(jnp.float32),          # (2, 1, 4H)
        })

    kf = 1.0 / math.sqrt(2 * H)
    fc_w = jax.random.uniform(next(keys), (output_dim, 2 * H), jnp.float32, -kf, kf)
    fc_b = jax.random.uniform(next(keys), (output_dim,), jnp.float32, -kf, kf)
    n_pad = ((output_dim + 127) // 128) * 128
    fc_w_t = jnp.zeros((2 * H, n_pad), jnp.float32).at[:, :output_dim].set(fc_w.T)
    params["fc_w"] = fc_w_t.reshape(2, H, n_pad).astype(weight_dtype)  # (2, H, n_pad)
    params["fc_b"] = fc_b[None, :]                                     # (1, out_dim) f32
    return params


if __name__ == "__main__":
    vocab_size = 50
    embedding_dim = 32
    hidden_dim = 32
    output_dim = 8
    n_layers = 2
    seq_len = 8
    batch = 2

    key = jax.random.PRNGKey(0)
    k_tok, k_params = jax.random.split(key)

    tokens = jax.random.randint(k_tok, (seq_len, batch), 0, vocab_size,
                                dtype=jnp.int32)
    params = init_params(k_params, vocab_size, embedding_dim, hidden_dim,
                         output_dim, n_layers)

    out = rnn_forward(tokens, params, hidden_dim=hidden_dim)
    out = jax.block_until_ready(out)
    assert out.shape == (batch, output_dim)
    assert out.dtype == jnp.float32
    print("KERNEL_OK")
</pallas_src>

<mosaic_0001>
module attributes {stable_mosaic.version = 11 : i64} {
  func.func @kernel(%arg0: i32, %arg1: memref<1x8x8x32xbf16, #tpu.memory_space<vmem>>, %arg2: memref<1x1x32x128xbf16, #tpu.memory_space<vmem>>, %arg3: memref<1x32x128xbf16, #tpu.memory_space<vmem>>, %arg4: memref<1x1x128xf32, #tpu.memory_space<vmem>>, %arg5: memref<1x8x8x32xbf16, #tpu.memory_space<vmem>>, %arg6: memref<8x8x128xf32, #tpu.memory_space<vmem>>) attributes {dimension_semantics = [#tpu.dimension_semantics<parallel>], iteration_bounds = array<i64: 2>, scalar_prefetch = 0 : i64, scratch_operands = 1 : i64, tpu.core_type = #tpu.core_type<tc>, window_params = [{pipeline_mode = #tpu.pipeline_mode<synchronous>, transform_indices = @transform_0, window_bounds = array<i64: 1, 8, 8, 32>}, {transform_indices = @transform_1, window_bounds = array<i64: 1, 1, 32, 128>}, {transform_indices = @transform_2, window_bounds = array<i64: 1, 32, 128>}, {transform_indices = @transform_3, window_bounds = array<i64: 1, 1, 128>}, {transform_indices = @transform_4, window_bounds = array<i64: 1, 8, 8, 32>}]} {
    %c1_i32 = arith.constant 1 : i32
    %0 = arith.cmpi eq, %arg0, %c1_i32 : i32
    %c0 = arith.constant 0 : index
    %c0_0 = arith.constant 0 : index
    %c0_1 = arith.constant 0 : index
    %c0_2 = arith.constant 0 : index
    %1 = vector.load %arg1[%c0, %c0_0, %c0_1, %c0_2] : memref<1x8x8x32xbf16, #tpu.memory_space<vmem>>, vector<1x8x8x32xbf16>
    %2 = vector.shape_cast %1 : vector<1x8x8x32xbf16> to vector<8x8x32xbf16>
    %3 = vector.shape_cast %2 : vector<8x8x32xbf16> to vector<64x32xbf16>
    %c0_3 = arith.constant 0 : index
    %c0_4 = arith.constant 0 : index
    %c0_5 = arith.constant 0 : index
    %c0_6 = arith.constant 0 : index
    %4 = vector.load %arg2[%c0_3, %c0_4, %c0_5, %c0_6] : memref<1x1x32x128xbf16, #tpu.memory_space<vmem>>, vector<1x1x32x128xbf16>
    %5 = vector.shape_cast %4 : vector<1x1x32x128xbf16> to vector<32x128xbf16>
    %cst = arith.constant dense<0.000000e+00> : vector<64x128xf32>
    %6 = tpu.matmul %3, %5, %cst {dimension_numbers = #tpu.dot_dimension_numbers<[1], [0], [0], [1], [0, 0, 1, 1], [], []>} : vector<64x32xbf16>, vector<32x128xbf16>, vector<64x128xf32> -> vector<64x128xf32>
    %7 = vector.shape_cast %6 : vector<64x128xf32> to vector<8x8x128xf32>
    %c0_7 = arith.constant 0 : index
    %c0_8 = arith.constant 0 : index
    %c0_9 = arith.constant 0 : index
    %8 = vector.load %arg4[%c0_7, %c0_8, %c0_9] : memref<1x1x128xf32, #tpu.memory_space<vmem>>, vector<1x1x128xf32>
    %9 = vector.shape_cast %8 : vector<1x1x128xf32> to vector<1x128xf32>
    %10 = vector.shape_cast %9 : vector<1x128xf32> to vector<1x1x128xf32>
    %11 = vector.broadcast %10 : vector<1x1x128xf32> to vector<8x8x128xf32>
    %12 = arith.addf %7, %11 : vector<8x8x128xf32>
    %c0_10 = arith.constant 0 : index
    %c0_11 = arith.constant 0 : index
    %c0_12 = arith.constant 0 : index
    %13 = vector.load %arg6[%c0_10, %c0_11, %c0_12] : memref<8x8x128xf32, #tpu.memory_space<vmem>>, vector<8x8x128xf32>
    tpu.vector_store %arg6[%c0_10, %c0_11, %c0_12], %12 {strides = array<i32>} : memref<8x8x128xf32, #tpu.memory_space<vmem>>, vector<8x8x128xf32>,
    %c0_13 = arith.constant 0 : index
    %c0_14 = arith.constant 0 : index
    %c0_15 = arith.constant 0 : index
    %14 = vector.load %arg3[%c0_13, %c0_14, %c0_15] : memref<1x32x128xbf16, #tpu.memory_space<vmem>>, vector<1x32x128xbf16>
    %15 = vector.shape_cast %14 : vector<1x32x128xbf16> to vector<32x128xbf16>
    %cst_16 = arith.constant 0.000000e+00 : f32
    %16 = vector.broadcast %cst_16 : f32 to vector<8x32xf32>
    %c0_i32 = arith.constant 0 : i32
    %c7_i32 = arith.constant 7 : i32
    %17 = arith.subi %c7_i32, %c0_i32 : i32
    %18 = arith.select %0, %17, %c0_i32 : i32
    %19 = arith.index_cast %18 : i32 to index
    %c0_17 = arith.constant 0 : index
    %c0_18 = arith.constant 0 : index
    %20 = vector.load %arg6[%19, %c0_17, %c0_18] : memref<8x8x128xf32, #tpu.memory_space<vmem>>, vector<1x8x128xf32>
    %21 = vector.shape_cast %20 : vector<1x8x128xf32> to vector<8x128xf32>
    %22 = arith.truncf %16 : vector<8x32xf32> to vector<8x32xbf16>
    %cst_19 = arith.constant dense<0.000000e+00> : vector<8x128xf32>
    %23 = tpu.matmul %22, %15, %cst_19 {dimension_numbers = #tpu.dot_dimension_numbers<[1], [0], [0], [1], [0, 0, 1, 1], [], []>} : vector<8x32xbf16>, vector<32x128xbf16>, vector<8x128xf32> -> vector<8x128xf32>
    %24 = arith.addf %21, %23 : vector<8x128xf32>
    %25 = vector.extract_strided_slice %24 {offsets = [0, 0], sizes = [8, 96], strides = [1, 1]} : vector<8x128xf32> to vector<8x96xf32>
    %26 = arith.negf %25 : vector<8x96xf32>
    %27 = math.exp %26 : vector<8x96xf32>
    %cst_20 = arith.constant 1.000000e+00 : f32
    %28 = vector.broadcast %cst_20 : f32 to vector<8x96xf32>
    %29 = arith.addf %28, %27 : vector<8x96xf32>
    %30 = arith.divf %28, %29 : vector<8x96xf32>
    %31 = vector.extract_strided_slice %30 {offsets = [0, 0], sizes = [8, 32], strides = [1, 1]} : vector<8x96xf32> to vector<8x32xf32>
    %32 = vector.extract_strided_slice %30 {offsets = [0, 32], sizes = [8, 32], strides = [1, 1]} : vector<8x96xf32> to vector<8x32xf32>
    %33 = vector.extract_strided_slice %30 {offsets = [0, 64], sizes = [8, 32], strides = [1, 1]} : vector<8x96xf32> to vector<8x32xf32>
    %34 = vector.extract_strided_slice %24 {offsets = [0, 96], sizes = [8, 32], strides = [1, 1]} : vector<8x128xf32> to vector<8x32xf32>
    %35 = math.tanh %34 : vector<8x32xf32>
    %36 = arith.mulf %32, %16 : vector<8x32xf32>
    %37 = arith.mulf %31, %35 : vector<8x32xf32>
    %38 = arith.addf %36, %37 : vector<8x32xf32>
    %39 = math.tanh %38 : vector<8x32xf32>
    %40 = arith.mulf %33, %39 : vector<8x32xf32>
    %41 = arith.truncf %40 : vector<8x32xf32> to vector<8x32xbf16>
    %c0_21 = arith.constant 0 : index
    %42 = arith.index_cast %18 : i32 to index
    %c0_22 = arith.constant 0 : index
    %c0_23 = arith.constant 0 : index
    %43 = vector.load %arg5[%c0_21, %42, %c0_22, %c0_23] : memref<1x8x8x32xbf16, #tpu.memory_space<vmem>>, vector<1x1x8x32xbf16>
    %44 = vector.shape_cast %43 : vector<1x1x8x32xbf16> to vector<8x32xbf16>
    %45 = vector.shape_cast %41 : vector<8x32xbf16> to vector<1x1x8x32xbf16>
    tpu.vector_store %arg5[%c0_21, %42, %c0_22, %c0_23], %45 {strides = array<i32>} : memref<1x8x8x32xbf16, #tpu.memory_space<vmem>>, vector<1x1x8x32xbf16>,
    %c1_i32_24 = arith.constant 1 : i32
    %c7_i32_25 = arith.constant 7 : i32
    %46 = arith.subi %c7_i32_25, %c1_i32_24 : i32
    %47 = arith.select %0, %46, %c1_i32_24 : i32
    %48 = arith.index_cast %47 : i32 to index
    %c0_26 = arith.constant 0 : index
    %c0_27 = arith.constant 0 : index
    %49 = vector.load %arg6[%48, %c0_26, %c0_27] : memref<8x8x128xf32, #tpu.memory_space<vmem>>, vector<1x8x128xf32>
    %50 = vector.shape_cast %49 : vector<1x8x128xf32> to vector<8x128xf32>
    %51 = arith.truncf %40 : vector<8x32xf32> to vector<8x32xbf16>
    %cst_28 = arith.constant dense<0.000000e+00> : vector<8x128xf32>
    %52 = tpu.matmul %51, %15, %cst_28 {dimension_numbers = #tpu.dot_dimension_numbers<[1], [0], [0], [1], [0, 0, 1, 1], [], []>} : vector<8x32xbf16>, vector<32x128xbf16>, vector<8x128xf32> -> vector<8x128xf32>
    %53 = arith.addf %50, %52 : vector<8x128xf32>
    %54 = vector.extract_strided_slice %53 {offsets = [0, 0], sizes = [8, 96], strides = [1, 1]} : vector<8x128xf32> to vector<8x96xf32>
    %55 = arith.negf %54 : vector<8x96xf32>
    %56 = math.exp %55 : vector<8x96xf32>
    %cst_29 = arith.constant 1.000000e+00 : f32
    %57 = vector.broadcast %cst_29 : f32 to vector<8x96xf32>
    %58 = arith.addf %57, %56 : vector<8x96xf32>
    %59 = arith.divf %57, %58 : vector<8x96xf32>
    %60 = vector.extract_strided_slice %59 {offsets = [0, 0], sizes = [8, 32], strides = [1, 1]} : vector<8x96xf32> to vector<8x32xf32>
    %61 = vector.extract_strided_slice %59 {offsets = [0, 32], sizes = [8, 32], strides = [1, 1]} : vector<8x96xf32> to vector<8x32xf32>
    %62 = vector.extract_strided_slice %59 {offsets = [0, 64], sizes = [8, 32], strides = [1, 1]} : vector<8x96xf32> to vector<8x32xf32>
    %63 = vector.extract_strided_slice %53 {offsets = [0, 96], sizes = [8, 32], strides = [1, 1]} : vector<8x128xf32> to vector<8x32xf32>
    %64 = math.tanh %63 : vector<8x32xf32>
    %65 = arith.mulf %61, %38 : vector<8x32xf32>
    %66 = arith.mulf %60, %64 : vector<8x32xf32>
    %67 = arith.addf %65, %66 : vector<8x32xf32>
    %68 = math.tanh %67 : vector<8x32xf32>
    %69 = arith.mulf %62, %68 : vector<8x32xf32>
    %70 = arith.truncf %69 : vector<8x32xf32> to vector<8x32xbf16>
    %c0_30 = arith.constant 0 : index
    %71 = arith.index_cast %47 : i32 to index
    %c0_31 = arith.constant 0 : index
    %c0_32 = arith.constant 0 : index
    %72 = vector.load %arg5[%c0_30, %71, %c0_31, %c0_32] : memref<1x8x8x32xbf16, #tpu.memory_space<vmem>>, vector<1x1x8x32xbf16>
    %73 = vector.shape_cast %72 : vector<1x1x8x32xbf16> to vector<8x32xbf16>
    %74 = vector.shape_cast %70 : vector<8x32xbf16> to vector<1x1x8x32xbf16>
    tpu.vector_store %arg5[%c0_30, %71, %c0_31, %c0_32], %74 {strides = array<i32>} : memref<1x8x8x32xbf16, #tpu.memory_space<vmem>>, vector<1x1x8x32xbf16>,
    %c2_i32 = arith.constant 2 : i32
    %c7_i32_33 = arith.constant 7 : i32
    %75 = arith.subi %c7_i32_33, %c2_i32 : i32
    %76 = arith.select %0, %75, %c2_i32 : i32
    %77 = arith.index_cast %76 : i32 to index
    %c0_34 = arith.constant 0 : index
    %c0_35 = arith.constant 0 : index
    %78 = vector.load %arg6[%77, %c0_34, %c0_35] : memref<8x8x128xf32, #tpu.memory_space<vmem>>, vector<1x8x128xf32>
    %79 = vector.shape_cast %78 : vector<1x8x128xf32> to vector<8x128xf32>
    %80 = arith.truncf %69 : vector<8x32xf32> to vector<8x32xbf16>
    %cst_36 = arith.constant dense<0.000000e+00> : vector<8x128xf32>
    %81 = tpu.matmul %80, %15, %cst_36 {dimension_numbers = #tpu.dot_dimension_numbers<[1], [0], [0], [1], [0, 0, 1, 1], [], []>} : vector<8x32xbf16>, vector<32x128xbf16>, vector<8x128xf32> -> vector<8x128xf32>
    %82 = arith.addf %79, %81 : vector<8x128xf32>
    %83 = vector.extract_strided_slice %82 {offsets = [0, 0], sizes = [8, 96], strides = [1, 1]} : vector<8x128xf32> to vector<8x96xf32>
    %84 = arith.negf %83 : vector<8x96xf32>
    %85 = math.exp %84 : vector<8x96xf32>
    %cst_37 = arith.constant 1.000000e+00 : f32
    %86 = vector.broadcast %cst_37 : f32 to vector<8x96xf32>
    %87 = arith.addf %86, %85 : vector<8x96xf32>
    %88 = arith.divf %86, %87 : vector<8x96xf32>
    %89 = vector.extract_strided_slice %88 {offsets = [0, 0], sizes = [8, 32], strides = [1, 1]} : vector<8x96xf32> to vector<8x32xf32>
    %90 = vector.extract_strided_slice %88 {offsets = [0, 32], sizes = [8, 32], strides = [1, 1]} : vector<8x96xf32> to vector<8x32xf32>
    %91 = vector.extract_strided_slice %88 {offsets = [0, 64], sizes = [8, 32], strides = [1, 1]} : vector<8x96xf32> to vector<8x32xf32>
    %92 = vector.extract_strided_slice %82 {offsets = [0, 96], sizes = [8, 32], strides = [1, 1]} : vector<8x128xf32> to vector<8x32xf32>
    %93 = math.tanh %92 : vector<8x32xf32>
    %94 = arith.mulf %90, %67 : vector<8x32xf32>
    %95 = arith.mulf %89, %93 : vector<8x32xf32>
    %96 = arith.addf %94, %95 : vector<8x32xf32>
    %97 = math.tanh %96 : vector<8x32xf32>
    %98 = arith.mulf %91, %97 : vector<8x32xf32>
    %99 = arith.truncf %98 : vector<8x32xf32> to vector<8x32xbf16>
    %c0_38 = arith.constant 0 : index
    %100 = arith.index_cast %76 : i32 to index
    %c0_39 = arith.constant 0 : index
    %c0_40 = arith.constant 0 : index
    %101 = vector.load %arg5[%c0_38, %100, %c0_39, %c0_40] : memref<1x8x8x32xbf16, #tpu.memory_space<vmem>>, vector<1x1x8x32xbf16>
    %102 = vector.shape_cast %101 : vector<1x1x8x32xbf16> to vector<8x32xbf16>
    %103 = vector.shape_cast %99 : vector<8x32xbf16> to vector<1x1x8x32xbf16>
    tpu.vector_store %arg5[%c0_38, %100, %c0_39, %c0_40], %103 {strides = array<i32>} : memref<1x8x8x32xbf16, #tpu.memory_space<vmem>>, vector<1x1x8x32xbf16>,
    %c3_i32 = arith.constant 3 : i32
    %c7_i32_41 = arith.constant 7 : i32
    %104 = arith.subi %c7_i32_41, %c3_i32 : i32
    %105 = arith.select %0, %104, %c3_i32 : i32
    %106 = arith.index_cast %105 : i32 to index
    %c0_42 = arith.constant 0 : index
    %c0_43 = arith.constant 0 : index
    %107 = vector.load %arg6[%106, %c0_42, %c0_43] : memref<8x8x128xf32, #tpu.memory_space<vmem>>, vector<1x8x128xf32>
    %108 = vector.shape_cast %107 : vector<1x8x128xf32> to vector<8x128xf32>
    %109 = arith.truncf %98 : vector<8x32xf32> to vector<8x32xbf16>
    %cst_44 = arith.constant dense<0.000000e+00> : vector<8x128xf32>
    %110 = tpu.matmul %109, %15, %cst_44 {dimension_numbers = #tpu.dot_dimension_numbers<[1], [0], [0], [1], [0, 0, 1, 1], [], []>} : vector<8x32xbf16>, vector<32x128xbf16>, vector<8x128xf32> -> vector<8x128xf32>
    %111 = arith.addf %108, %110 : vector<8x128xf32>
    %112 = vector.extract_strided_slice %111 {offsets = [0, 0], sizes = [8, 96], strides = [1, 1]} : vector<8x128xf32> to vector<8x96xf32>
    %113 = arith.negf %112 : vector<8x96xf32>
    %114 = math.exp %113 : vector<8x96xf32>
    %cst_45 = arith.constant 1.000000e+00 : f32
    %115 = vector.broadcast %cst_45 : f32 to vector<8x96xf32>
    %116 = arith.addf %115, %114 : vector<8x96xf32>
    %117 = arith.divf %115, %116 : vector<8x96xf32>
    %118 = vector.extract_strided_slice %117 {offsets = [0, 0], sizes = [8, 32], strides = [1, 1]} : vector<8x96xf32> to vector<8x32xf32>
    %119 = vector.extract_strided_slice %117 {offsets = [0, 32], sizes = [8, 32], strides = [1, 1]} : vector<8x96xf32> to vector<8x32xf32>
    %120 = vector.extract_strided_slice %117 {offsets = [0, 64], sizes = [8, 32], strides = [1, 1]} : vector<8x96xf32> to vector<8x32xf32>
    %121 = vector.extract_strided_slice %111 {offsets = [0, 96], sizes = [8, 32], strides = [1, 1]} : vector<8x128xf32> to vector<8x32xf32>
    %122 = math.tanh %121 : vector<8x32xf32>
    %123 = arith.mulf %119, %96 : vector<8x32xf32>
    %124 = arith.mulf %118, %122 : vector<8x32xf32>
    %125 = arith.addf %123, %124 : vector<8x32xf32>
    %126 = math.tanh %125 : vector<8x32xf32>
    %127 = arith.mulf %120, %126 : vector<8x32xf32>
    %128 = arith.truncf %127 : vector<8x32xf32> to vector<8x32xbf16>
    %c0_46 = arith.constant 0 : index
    %129 = arith.index_cast %105 : i32 to index
    %c0_47 = arith.constant 0 : index
    %c0_48 = arith.constant 0 : index
    %130 = vector.load %arg5[%c0_46, %129, %c0_47, %c0_48] : memref<1x8x8x32xbf16, #tpu.memory_space<vmem>>, vector<1x1x8x32xbf16>
    %131 = vector.shape_cast %130 : vector<1x1x8x32xbf16> to vector<8x32xbf16>
    %132 = vector.shape_cast %128 : vector<8x32xbf16> to vector<1x1x8x32xbf16>
    tpu.vector_store %arg5[%c0_46, %129, %c0_47, %c0_48], %132 {strides = array<i32>} : memref<1x8x8x32xbf16, #tpu.memory_space<vmem>>, vector<1x1x8x32xbf16>,
    %c4_i32 = arith.constant 4 : i32
    %c7_i32_49 = arith.constant 7 : i32
    %133 = arith.subi %c7_i32_49, %c4_i32 : i32
    %134 = arith.select %0, %133, %c4_i32 : i32
    %135 = arith.index_cast %134 : i32 to index
    %c0_50 = arith.constant 0 : index
    %c0_51 = arith.constant 0 : index
    %136 = vector.load %arg6[%135, %c0_50, %c0_51] : memref<8x8x128xf32, #tpu.memory_space<vmem>>, vector<1x8x128xf32>
    %137 = vector.shape_cast %136 : vector<1x8x128xf32> to vector<8x128xf32>
    %138 = arith.truncf %127 : vector<8x32xf32> to vector<8x32xbf16>
    %cst_52 = arith.constant dense<0.000000e+00> : vector<8x128xf32>
    %139 = tpu.matmul %138, %15, %cst_52 {dimension_numbers = #tpu.dot_dimension_numbers<[1], [0], [0], [1], [0, 0, 1, 1], [], []>} : vector<8x32xbf16>, vector<32x128xbf16>, vector<8x128xf32> -> vector<8x128xf32>
    %140 = arith.addf %137, %139 : vector<8x128xf32>
    %141 = vector.extract_strided_slice %140 {offsets = [0, 0], sizes = [8, 96], strides = [1, 1]} : vector<8x128xf32> to vector<8x96xf32>
    %142 = arith.negf %141 : vector<8x96xf32>
    %143 = math.exp %142 : vector<8x96xf32>
    %cst_53 = arith.constant 1.000000e+00 : f32
    %144 = vector.broadcast %cst_53 : f32 to vector<8x96xf32>
    %145 = arith.addf %144, %143 : vector<8x96xf32>
    %146 = arith.divf %144, %145 : vector<8x96xf32>
    %147 = vector.extract_strided_slice %146 {offsets = [0, 0], sizes = [8, 32], strides = [1, 1]} : vector<8x96xf32> to vector<8x32xf32>
    %148 = vector.extract_strided_slice %146 {offsets = [0, 32], sizes = [8, 32], strides = [1, 1]} : vector<8x96xf32> to vector<8x32xf32>
    %149 = vector.extract_strided_slice %146 {offsets = [0, 64], sizes = [8, 32], strides = [1, 1]} : vector<8x96xf32> to vector<8x32xf32>
    %150 = vector.extract_strided_slice %140 {offsets = [0, 96], sizes = [8, 32], strides = [1, 1]} : vector<8x128xf32> to vector<8x32xf32>
    %151 = math.tanh %150 : vector<8x32xf32>
    %152 = arith.mulf %148, %125 : vector<8x32xf32>
    %153 = arith.mulf %147, %151 : vector<8x32xf32>
    %154 = arith.addf %152, %153 : vector<8x32xf32>
    %155 = math.tanh %154 : vector<8x32xf32>
    %156 = arith.mulf %149, %155 : vector<8x32xf32>
    %157 = arith.truncf %156 : vector<8x32xf32> to vector<8x32xbf16>
    %c0_54 = arith.constant 0 : index
    %158 = arith.index_cast %134 : i32 to index
    %c0_55 = arith.constant 0 : index
    %c0_56 = arith.constant 0 : index
    %159 = vector.load %arg5[%c0_54, %158, %c0_55, %c0_56] : memref<1x8x8x32xbf16, #tpu.memory_space<vmem>>, vector<1x1x8x32xbf16>
    %160 = vector.shape_cast %159 : vector<1x1x8x32xbf16> to vector<8x32xbf16>
    %161 = vector.shape_cast %157 : vector<8x32xbf16> to vector<1x1x8x32xbf16>
    tpu.vector_store %arg5[%c0_54, %158, %c0_55, %c0_56], %161 {strides = array<i32>} : memref<1x8x8x32xbf16, #tpu.memory_space<vmem>>, vector<1x1x8x32xbf16>,
    %c5_i32 = arith.constant 5 : i32
    %c7_i32_57 = arith.constant 7 : i32
    %162 = arith.subi %c7_i32_57, %c5_i32 : i32
    %163 = arith.select %0, %162, %c5_i32 : i32
    %164 = arith.index_cast %163 : i32 to index
    %c0_58 = arith.constant 0 : index
    %c0_59 = arith.constant 0 : index
    %165 = vector.load %arg6[%164, %c0_58, %c0_59] : memref<8x8x128xf32, #tpu.memory_space<vmem>>, vector<1x8x128xf32>
    %166 = vector.shape_cast %165 : vector<1x8x128xf32> to vector<8x128xf32>
    %167 = arith.truncf %156 : vector<8x32xf32> to vector<8x32xbf16>
    %cst_60 = arith.constant dense<0.000000e+00> : vector<8x128xf32>
    %168 = tpu.matmul %167, %15, %cst_60 {dimension_numbers = #tpu.dot_dimension_numbers<[1], [0], [0], [1], [0, 0, 1, 1], [], []>} : vector<8x32xbf16>, vector<32x128xbf16>, vector<8x128xf32> -> vector<8x128xf32>
    %169 = arith.addf %166, %168 : vector<8x128xf32>
    %170 = vector.extract_strided_slice %169 {offsets = [0, 0], sizes = [8, 96], strides = [1, 1]} : vector<8x128xf32> to vector<8x96xf32>
    %171 = arith.negf %170 : vector<8x96xf32>
    %172 = math.exp %171 : vector<8x96xf32>
    %cst_61 = arith.constant 1.000000e+00 : f32
    %173 = vector.broadcast %cst_61 : f32 to vector<8x96xf32>
    %174 = arith.addf %173, %172 : vector<8x96xf32>
    %175 = arith.divf %173, %174 : vector<8x96xf32>
    %176 = vector.extract_strided_slice %175 {offsets = [0, 0], sizes = [8, 32], strides = [1, 1]} : vector<8x96xf32> to vector<8x32xf32>
    %177 = vector.extract_strided_slice %175 {offsets = [0, 32], sizes = [8, 32], strides = [1, 1]} : vector<8x96xf32> to vector<8x32xf32>
    %178 = vector.extract_strided_slice %175 {offsets = [0, 64], sizes = [8, 32], strides = [1, 1]} : vector<8x96xf32> to vector<8x32xf32>
    %179 = vector.extract_strided_slice %169 {offsets = [0, 96], sizes = [8, 32], strides = [1, 1]} : vector<8x128xf32> to vector<8x32xf32>
    %180 = math.tanh %179 : vector<8x32xf32>
    %181 = arith.mulf %177, %154 : vector<8x32xf32>
    %182 = arith.mulf %176, %180 : vector<8x32xf32>
    %183 = arith.addf %181, %182 : vector<8x32xf32>
    %184 = math.tanh %183 : vector<8x32xf32>
    %185 = arith.mulf %178, %184 : vector<8x32xf32>
    %186 = arith.truncf %185 : vector<8x32xf32> to vector<8x32xbf16>
    %c0_62 = arith.constant 0 : index
    %187 = arith.index_cast %163 : i32 to index
    %c0_63 = arith.constant 0 : index
    %c0_64 = arith.constant 0 : index
    %188 = vector.load %arg5[%c0_62, %187, %c0_63, %c0_64] : memref<1x8x8x32xbf16, #tpu.memory_space<vmem>>, vector<1x1x8x32xbf16>
    %189 = vector.shape_cast %188 : vector<1x1x8x32xbf16> to vector<8x32xbf16>
    %190 = vector.shape_cast %186 : vector<8x32xbf16> to vector<1x1x8x32xbf16>
    tpu.vector_store %arg5[%c0_62, %187, %c0_63, %c0_64], %190 {strides = array<i32>} : memref<1x8x8x32xbf16, #tpu.memory_space<vmem>>, vector<1x1x8x32xbf16>,
    %c6_i32 = arith.constant 6 : i32
    %c7_i32_65 = arith.constant 7 : i32
    %191 = arith.subi %c7_i32_65, %c6_i32 : i32
    %192 = arith.select %0, %191, %c6_i32 : i32
    %193 = arith.index_cast %192 : i32 to index
    %c0_66 = arith.constant 0 : index
    %c0_67 = arith.constant 0 : index
    %194 = vector.load %arg6[%193, %c0_66, %c0_67] : memref<8x8x128xf32, #tpu.memory_space<vmem>>, vector<1x8x128xf32>
    %195 = vector.shape_cast %194 : vector<1x8x128xf32> to vector<8x128xf32>
    %196 = arith.truncf %185 : vector<8x32xf32> to vector<8x32xbf16>
    %cst_68 = arith.constant dense<0.000000e+00> : vector<8x128xf32>
    %197 = tpu.matmul %196, %15, %cst_68 {dimension_numbers = #tpu.dot_dimension_numbers<[1], [0], [0], [1], [0, 0, 1, 1], [], []>} : vector<8x32xbf16>, vector<32x128xbf16>, vector<8x128xf32> -> vector<8x128xf32>
    %198 = arith.addf %195, %197 : vector<8x128xf32>
    %199 = vector.extract_strided_slice %198 {offsets = [0, 0], sizes = [8, 96], strides = [1, 1]} : vector<8x128xf32> to vector<8x96xf32>
    %200 = arith.negf %199 : vector<8x96xf32>
    %201 = math.exp %200 : vector<8x96xf32>
    %cst_69 = arith.constant 1.000000e+00 : f32
    %202 = vector.broadcast %cst_69 : f32 to vector<8x96xf32>
    %203 = arith.addf %202, %201 : vector<8x96xf32>
    %204 = arith.divf %202, %203 : vector<8x96xf32>
    %205 = vector.extract_strided_slice %204 {offsets = [0, 0], sizes = [8, 32], strides = [1, 1]} : vector<8x96xf32> to vector<8x32xf32>
    %206 = vector.extract_strided_slice %204 {offsets = [0, 32], sizes = [8, 32], strides = [1, 1]} : vector<8x96xf32> to vector<8x32xf32>
    %207 = vector.extract_strided_slice %204 {offsets = [0, 64], sizes = [8, 32], strides = [1, 1]} : vector<8x96xf32> to vector<8x32xf32>
    %208 = vector.extract_strided_slice %198 {offsets = [0, 96], sizes = [8, 32], strides = [1, 1]} : vector<8x128xf32> to vector<8x32xf32>
    %209 = math.tanh %208 : vector<8x32xf32>
    %210 = arith.mulf %206, %183 : vector<8x32xf32>
    %211 = arith.mulf %205, %209 : vector<8x32xf32>
    %212 = arith.addf %210, %211 : vector<8x32xf32>
    %213 = math.tanh %212 : vector<8x32xf32>
    %214 = arith.mulf %207, %213 : vector<8x32xf32>
    %215 = arith.truncf %214 : vector<8x32xf32> to vector<8x32xbf16>
    %c0_70 = arith.constant 0 : index
    %216 = arith.index_cast %192 : i32 to index
    %c0_71 = arith.constant 0 : index
    %c0_72 = arith.constant 0 : index
    %217 = vector.load %arg5[%c0_70, %216, %c0_71, %c0_72] : memref<1x8x8x32xbf16, #tpu.memory_space<vmem>>, vector<1x1x8x32xbf16>
    %218 = vector.shape_cast %217 : vector<1x1x8x32xbf16> to vector<8x32xbf16>
    %219 = vector.shape_cast %215 : vector<8x32xbf16> to vector<1x1x8x32xbf16>
    tpu.vector_store %arg5[%c0_70, %216, %c0_71, %c0_72], %219 {strides = array<i32>} : memref<1x8x8x32xbf16, #tpu.memory_space<vmem>>, vector<1x1x8x32xbf16>,
    %c7_i32_73 = arith.constant 7 : i32
    %c7_i32_74 = arith.constant 7 : i32
    %220 = arith.subi %c7_i32_74, %c7_i32_73 : i32
    %221 = arith.select %0, %220, %c7_i32_73 : i32
    %222 = arith.index_cast %221 : i32 to index
    %c0_75 = arith.constant 0 : index
    %c0_76 = arith.constant 0 : index
    %223 = vector.load %arg6[%222, %c0_75, %c0_76] : memref<8x8x128xf32, #tpu.memory_space<vmem>>, vector<1x8x128xf32>
    %224 = vector.shape_cast %223 : vector<1x8x128xf32> to vector<8x128xf32>
    %225 = arith.truncf %214 : vector<8x32xf32> to vector<8x32xbf16>
    %cst_77 = arith.constant dense<0.000000e+00> : vector<8x128xf32>
    %226 = tpu.matmul %225, %15, %cst_77 {dimension_numbers = #tpu.dot_dimension_numbers<[1], [0], [0], [1], [0, 0, 1, 1], [], []>} : vector<8x32xbf16>, vector<32x128xbf16>, vector<8x128xf32> -> vector<8x128xf32>
    %227 = arith.addf %224, %226 : vector<8x128xf32>
    %228 = vector.extract_strided_slice %227 {offsets = [0, 0], sizes = [8, 96], strides = [1, 1]} : vector<8x128xf32> to vector<8x96xf32>
    %229 = arith.negf %228 : vector<8x96xf32>
    %230 = math.exp %229 : vector<8x96xf32>
    %cst_78 = arith.constant 1.000000e+00 : f32
    %231 = vector.broadcast %cst_78 : f32 to vector<8x96xf32>
    %232 = arith.addf %231, %230 : vector<8x96xf32>
    %233 = arith.divf %231, %232 : vector<8x96xf32>
    %234 = vector.extract_strided_slice %233 {offsets = [0, 0], sizes = [8, 32], strides = [1, 1]} : vector<8x96xf32> to vector<8x32xf32>
    %235 = vector.extract_strided_slice %233 {offsets = [0, 32], sizes = [8, 32], strides = [1, 1]} : vector<8x96xf32> to vector<8x32xf32>
    %236 = vector.extract_strided_slice %233 {offsets = [0, 64], sizes = [8, 32], strides = [1, 1]} : vector<8x96xf32> to vector<8x32xf32>
    %237 = vector.extract_strided_slice %227 {offsets = [0, 96], sizes = [8, 32], strides = [1, 1]} : vector<8x128xf32> to vector<8x32xf32>
    %238 = math.tanh %237 : vector<8x32xf32>
    %239 = arith.mulf %235, %212 : vector<8x32xf32>
    %240 = arith.mulf %234, %238 : vector<8x32xf32>
    %241 = arith.addf %239, %240 : vector<8x32xf32>
    %242 = math.tanh %241 : vector<8x32xf32>
    %243 = arith.mulf %236, %242 : vector<8x32xf32>
    %244 = arith.truncf %243 : vector<8x32xf32> to vector<8x32xbf16>
    %c0_79 = arith.constant 0 : index
    %245 = arith.index_cast %221 : i32 to index
    %c0_80 = arith.constant 0 : index
    %c0_81 = arith.constant 0 : index
    %246 = vector.load %arg5[%c0_79, %245, %c0_80, %c0_81] : memref<1x8x8x32xbf16, #tpu.memory_space<vmem>>, vector<1x1x8x32xbf16>
    %247 = vector.shape_cast %246 : vector<1x1x8x32xbf16> to vector<8x32xbf16>
    %248 = vector.shape_cast %244 : vector<8x32xbf16> to vector<1x1x8x32xbf16>
    tpu.vector_store %arg5[%c0_79, %245, %c0_80, %c0_81], %248 {strides = array<i32>} : memref<1x8x8x32xbf16, #tpu.memory_space<vmem>>, vector<1x1x8x32xbf16>,
    %c8_i32 = arith.constant 8 : i32
    return
  }
  func.func @transform_0(%arg0: i32) -> (i32, i32, i32, i32) {
    %c0_i32 = arith.constant 0 : i32
    %c0_i32_0 = arith.constant 0 : i32
    %c0_i32_1 = arith.constant 0 : i32
    %c0_i32_2 = arith.constant 0 : i32
    %c0_i32_3 = arith.constant 0 : i32
    return %c0_i32, %c0_i32_0, %c0_i32_1, %c0_i32_2 : i32, i32, i32, i32
  }
  func.func @transform_1(%arg0: i32) -> (i32, i32, i32, i32) {
    %c0_i32 = arith.constant 0 : i32
    %c0_i32_0 = arith.constant 0 : i32
    %c0_i32_1 = arith.constant 0 : i32
    %c0_i32_2 = arith.constant 0 : i32
    return %arg0, %c0_i32, %c0_i32_0, %c0_i32_1 : i32, i32, i32, i32
  }
  func.func @transform_2(%arg0: i32) -> (i32, i32, i32) {
    %c0_i32 = arith.constant 0 : i32
    %c0_i32_0 = arith.constant 0 : i32
    %c0_i32_1 = arith.constant 0 : i32
    return %arg0, %c0_i32, %c0_i32_0 : i32, i32, i32
  }
  func.func @transform_3(%arg0: i32) -> (i32, i32, i32) {
    %c0_i32 = arith.constant 0 : i32
    %c0_i32_0 = arith.constant 0 : i32
    %c0_i32_1 = arith.constant 0 : i32
    return %arg0, %c0_i32, %c0_i32_0 : i32, i32, i32
  }
  func.func @transform_4(%arg0: i32) -> (i32, i32, i32, i32) {
    %c0_i32 = arith.constant 0 : i32
    %c0_i32_0 = arith.constant 0 : i32
    %c0_i32_1 = arith.constant 0 : i32
    %c0_i32_2 = arith.constant 0 : i32
    return %arg0, %c0_i32, %c0_i32_0, %c0_i32_1 : i32, i32, i32, i32
  }
}

module attributes {stable_mosaic.version = 11 : i64} {
  func.func @kernel(%arg0: i32, %arg1: memref<2x8x8x32xbf16, #tpu.memory_space<vmem>>, %arg2: memref<1x2x32x128xbf16, #tpu.memory_space<vmem>>, %arg3: memref<1x32x128xbf16, #tpu.memory_space<vmem>>, %arg4: memref<1x1x128xf32, #tpu.memory_space<vmem>>, %arg5: memref<1x32x128xbf16, #tpu.memory_space<vmem>>, %arg6: memref<1x8x128xf32, #tpu.memory_space<vmem>>, %arg7: memref<8x8x128xf32, #tpu.memory_space<vmem>>) attributes {dimension_semantics = [#tpu.dimension_semantics<parallel>], iteration_bounds = array<i64: 2>, scalar_prefetch = 0 : i64, scratch_operands = 1 : i64, tpu.core_type = #tpu.core_type<tc>, window_params = [{pipeline_mode = #tpu.pipeline_mode<synchronous>, transform_indices = @transform_0, window_bounds = array<i64: 2, 8, 8, 32>}, {transform_indices = @transform_1, window_bounds = array<i64: 1, 2, 32, 128>}, {transform_indices = @transform_2, window_bounds = array<i64: 1, 32, 128>}, {transform_indices = @transform_3, window_bounds = array<i64: 1, 1, 128>}, {transform_indices = @transform_4, window_bounds = array<i64: 1, 32, 128>}, {transform_indices = @transform_5, window_bounds = array<i64: 1, 8, 128>}]} {
    %c1_i32 = arith.constant 1 : i32
    %0 = arith.cmpi eq, %arg0, %c1_i32 : i32
    %c0 = arith.constant 0 : index
    %c0_0 = arith.constant 0 : index
    %c0_1 = arith.constant 0 : index
    %c0_2 = arith.constant 0 : index
    %1 = vector.load %arg1[%c0, %c0_0, %c0_1, %c0_2] : memref<2x8x8x32xbf16, #tpu.memory_space<vmem>>, vector<1x8x8x32xbf16>
    %2 = vector.shape_cast %1 : vector<1x8x8x32xbf16> to vector<8x8x32xbf16>
    %3 = vector.shape_cast %2 : vector<8x8x32xbf16> to vector<64x32xbf16>
    %c0_3 = arith.constant 0 : index
    %c0_4 = arith.constant 0 : index
    %c0_5 = arith.constant 0 : index
    %c0_6 = arith.constant 0 : index
    %4 = vector.load %arg2[%c0_3, %c0_4, %c0_5, %c0_6] : memref<1x2x32x128xbf16, #tpu.memory_space<vmem>>, vector<1x1x32x128xbf16>
    %5 = vector.shape_cast %4 : vector<1x1x32x128xbf16> to vector<32x128xbf16>
    %cst = arith.constant dense<0.000000e+00> : vector<64x128xf32>
    %6 = tpu.matmul %3, %5, %cst {dimension_numbers = #tpu.dot_dimension_numbers<[1], [0], [0], [1], [0, 0, 1, 1], [], []>} : vector<64x32xbf16>, vector<32x128xbf16>, vector<64x128xf32> -> vector<64x128xf32>
    %c1 = arith.constant 1 : index
    %c0_7 = arith.constant 0 : index
    %c0_8 = arith.constant 0 : index
    %c0_9 = arith.constant 0 : index
    %7 = vector.load %arg1[%c1, %c0_7, %c0_8, %c0_9] : memref<2x8x8x32xbf16, #tpu.memory_space<vmem>>, vector<1x8x8x32xbf16>
    %8 = vector.shape_cast %7 : vector<1x8x8x32xbf16> to vector<8x8x32xbf16>
    %9 = vector.shape_cast %8 : vector<8x8x32xbf16> to vector<64x32xbf16>
    %c0_10 = arith.constant 0 : index
    %c1_11 = arith.constant 1 : index
    %c0_12 = arith.constant 0 : index
    %c0_13 = arith.constant 0 : index
    %10 = vector.load %arg2[%c0_10, %c1_11, %c0_12, %c0_13] : memref<1x2x32x128xbf16, #tpu.memory_space<vmem>>, vector<1x1x32x128xbf16>
    %11 = vector.shape_cast %10 : vector<1x1x32x128xbf16> to vector<32x128xbf16>
    %cst_14 = arith.constant dense<0.000000e+00> : vector<64x128xf32>
    %12 = tpu.matmul %9, %11, %cst_14 {dimension_numbers = #tpu.dot_dimension_numbers<[1], [0], [0], [1], [0, 0, 1, 1], [], []>} : vector<64x32xbf16>, vector<32x128xbf16>, vector<64x128xf32> -> vector<64x128xf32>
    %13 = arith.addf %6, %12 : vector<64x128xf32>
    %14 = vector.shape_cast %13 : vector<64x128xf32> to vector<8x8x128xf32>
    %c0_15 = arith.constant 0 : index
    %c0_16 = arith.constant 0 : index
    %c0_17 = arith.constant 0 : index
    %15 = vector.load %arg4[%c0_15, %c0_16, %c0_17] : memref<1x1x128xf32, #tpu.memory_space<vmem>>, vector<1x1x128xf32>
    %16 = vector.shape_cast %15 : vector<1x1x128xf32> to vector<1x128xf32>
    %17 = vector.shape_cast %16 : vector<1x128xf32> to vector<1x1x128xf32>
    %18 = vector.broadcast %17 : vector<1x1x128xf32> to vector<8x8x128xf32>
    %19 = arith.addf %14, %18 : vector<8x8x128xf32>
    %c0_18 = arith.constant 0 : index
    %c0_19 = arith.constant 0 : index
    %c0_20 = arith.constant 0 : index
    %20 = vector.load %arg7[%c0_18, %c0_19, %c0_20] : memref<8x8x128xf32, #tpu.memory_space<vmem>>, vector<8x8x128xf32>
    tpu.vector_store %arg7[%c0_18, %c0_19, %c0_20], %19 {strides = array<i32>} : memref<8x8x128xf32, #tpu.memory_space<vmem>>, vector<8x8x128xf32>,
    %c0_21 = arith.constant 0 : index
    %c0_22 = arith.constant 0 : index
    %c0_23 = arith.constant 0 : index
    %21 = vector.load %arg3[%c0_21, %c0_22, %c0_23] : memref<1x32x128xbf16, #tpu.memory_space<vmem>>, vector<1x32x128xbf16>
    %22 = vector.shape_cast %21 : vector<1x32x128xbf16> to vector<32x128xbf16>
    %cst_24 = arith.constant 0.000000e+00 : f32
    %23 = vector.broadcast %cst_24 : f32 to vector<8x32xf32>
    %c0_i32 = arith.constant 0 : i32
    %c7_i32 = arith.constant 7 : i32
    %24 = arith.subi %c7_i32, %c0_i32 : i32
    %25 = arith.select %0, %24, %c0_i32 : i32
    %26 = arith.index_cast %25 : i32 to index
    %c0_25 = arith.constant 0 : index
    %c0_26 = arith.constant 0 : index
    %27 = vector.load %arg7[%26, %c0_25, %c0_26] : memref<8x8x128xf32, #tpu.memory_space<vmem>>, vector<1x8x128xf32>
    %28 = vector.shape_cast %27 : vector<1x8x128xf32> to vector<8x128xf32>
    %29 = arith.truncf %23 : vector<8x32xf32> to vector<8x32xbf16>
    %cst_27 = arith.constant dense<0.000000e+00> : vector<8x128xf32>
    %30 = tpu.matmul %29, %22, %cst_27 {dimension_numbers = #tpu.dot_dimension_numbers<[1], [0], [0], [1], [0, 0, 1, 1], [], []>} : vector<8x32xbf16>, vector<32x128xbf16>, vector<8x128xf32> -> vector<8x128xf32>
    %31 = arith.addf %28, %30 : vector<8x128xf32>
    %32 = vector.extract_strided_slice %31 {offsets = [0, 0], sizes = [8, 96], strides = [1, 1]} : vector<8x128xf32> to vector<8x96xf32>
    %33 = arith.negf %32 : vector<8x96xf32>
    %34 = math.exp %33 : vector<8x96xf32>
    %cst_28 = arith.constant 1.000000e+00 : f32
    %35 = vector.broadcast %cst_28 : f32 to vector<8x96xf32>
    %36 = arith.addf %35, %34 : vector<8x96xf32>
    %37 = arith.divf %35, %36 : vector<8x96xf32>
    %38 = vector.extract_strided_slice %37 {offsets = [0, 0], sizes = [8, 32], strides = [1, 1]} : vector<8x96xf32> to vector<8x32xf32>
    %39 = vector.extract_strided_slice %37 {offsets = [0, 32], sizes = [8, 32], strides = [1, 1]} : vector<8x96xf32> to vector<8x32xf32>
    %40 = vector.extract_strided_slice %37 {offsets = [0, 64], sizes = [8, 32], strides = [1, 1]} : vector<8x96xf32> to vector<8x32xf32>
    %41 = vector.extract_strided_slice %31 {offsets = [0, 96], sizes = [8, 32], strides = [1, 1]} : vector<8x128xf32> to vector<8x32xf32>
    %42 = math.tanh %41 : vector<8x32xf32>
    %43 = arith.mulf %39, %23 : vector<8x32xf32>
    %44 = arith.mulf %38, %42 : vector<8x32xf32>
    %45 = arith.addf %43, %44 : vector<8x32xf32>
    %46 = math.tanh %45 : vector<8x32xf32>
    %47 = arith.mulf %40, %46 : vector<8x32xf32>
    %c1_i32_29 = arith.constant 1 : i32
    %c7_i32_30 = arith.constant 7 : i32
    %48 = arith.subi %c7_i32_30, %c1_i32_29 : i32
    %49 = arith.select %0, %48, %c1_i32_29 : i32
    %50 = arith.index_cast %49 : i32 to index
    %c0_31 = arith.constant 0 : index
    %c0_32 = arith.constant 0 : index
    %51 = vector.load %arg7[%50, %c0_31, %c0_32] : memref<8x8x128xf32, #tpu.memory_space<vmem>>, vector<1x8x128xf32>
    %52 = vector.shape_cast %51 : vector<1x8x128xf32> to vector<8x128xf32>
    %53 = arith.truncf %47 : vector<8x32xf32> to vector<8x32xbf16>
    %cst_33 = arith.constant dense<0.000000e+00> : vector<8x128xf32>
    %54 = tpu.matmul %53, %22, %cst_33 {dimension_numbers = #tpu.dot_dimension_numbers<[1], [0], [0], [1], [0, 0, 1, 1], [], []>} : vector<8x32xbf16>, vector<32x128xbf16>, vector<8x128xf32> -> vector<8x128xf32>
    %55 = arith.addf %52, %54 : vector<8x128xf32>
    %56 = vector.extract_strided_slice %55 {offsets = [0, 0], sizes = [8, 96], strides = [1, 1]} : vector<8x128xf32> to vector<8x96xf32>
    %57 = arith.negf %56 : vector<8x96xf32>
    %58 = math.exp %57 : vector<8x96xf32>
    %cst_34 = arith.constant 1.000000e+00 : f32
    %59 = vector.broadcast %cst_34 : f32 to vector<8x96xf32>
    %60 = arith.addf %59, %58 : vector<8x96xf32>
    %61 = arith.divf %59, %60 : vector<8x96xf32>
    %62 = vector.extract_strided_slice %61 {offsets = [0, 0], sizes = [8, 32], strides = [1, 1]} : vector<8x96xf32> to vector<8x32xf32>
    %63 = vector.extract_strided_slice %61 {offsets = [0, 32], sizes = [8, 32], strides = [1, 1]} : vector<8x96xf32> to vector<8x32xf32>
    %64 = vector.extract_strided_slice %61 {offsets = [0, 64], sizes = [8, 32], strides = [1, 1]} : vector<8x96xf32> to vector<8x32xf32>
    %65 = vector.extract_strided_slice %55 {offsets = [0, 96], sizes = [8, 32], strides = [1, 1]} : vector<8x128xf32> to vector<8x32xf32>
    %66 = math.tanh %65 : vector<8x32xf32>
    %67 = arith.mulf %63, %45 : vector<8x32xf32>
    %68 = arith.mulf %62, %66 : vector<8x32xf32>
    %69 = arith.addf %67, %68 : vector<8x32xf32>
    %70 = math.tanh %69 : vector<8x32xf32>
    %71 = arith.mulf %64, %70 : vector<8x32xf32>
    %c2_i32 = arith.constant 2 : i32
    %c7_i32_35 = arith.constant 7 : i32
    %72 = arith.subi %c7_i32_35, %c2_i32 : i32
    %73 = arith.select %0, %72, %c2_i32 : i32
    %74 = arith.index_cast %73 : i32 to index
    %c0_36 = arith.constant 0 : index
    %c0_37 = arith.constant 0 : index
    %75 = vector.load %arg7[%74, %c0_36, %c0_37] : memref<8x8x128xf32, #tpu.memory_space<vmem>>, vector<1x8x128xf32>
    %76 = vector.shape_cast %75 : vector<1x8x128xf32> to vector<8x128xf32>
    %77 = arith.truncf %71 : vector<8x32xf32> to vector<8x32xbf16>
    %cst_38 = arith.constant dense<0.000000e+00> : vector<8x128xf32>
    %78 = tpu.matmul %77, %22, %cst_38 {dimension_numbers = #tpu.dot_dimension_numbers<[1], [0], [0], [1], [0, 0, 1, 1], [], []>} : vector<8x32xbf16>, vector<32x128xbf16>, vector<8x128xf32> -> vector<8x128xf32>
    %79 = arith.addf %76, %78 : vector<8x128xf32>
    %80 = vector.extract_strided_slice %79 {offsets = [0, 0], sizes = [8, 96], strides = [1, 1]} : vector<8x128xf32> to vector<8x96xf32>
    %81 = arith.negf %80 : vector<8x96xf32>
    %82 = math.exp %81 : vector<8x96xf32>
    %cst_39 = arith.constant 1.000000e+00 : f32
    %83 = vector.broadcast %cst_39 : f32 to vector<8x96xf32>
    %84 = arith.addf %83, %82 : vector<8x96xf32>
    %85 = arith.divf %83, %84 : vector<8x96xf32>
    %86 = vector.extract_strided_slice %85 {offsets = [0, 0], sizes = [8, 32], strides = [1, 1]} : vector<8x96xf32> to vector<8x32xf32>
    %87 = vector.extract_strided_slice %85 {offsets = [0, 32], sizes = [8, 32], strides = [1, 1]} : vector<8x96xf32> to vector<8x32xf32>
    %88 = vector.extract_strided_slice %85 {offsets = [0, 64], sizes = [8, 32], strides = [1, 1]} : vector<8x96xf32> to vector<8x32xf32>
    %89 = vector.extract_strided_slice %79 {offsets = [0, 96], sizes = [8, 32], strides = [1, 1]} : vector<8x128xf32> to vector<8x32xf32>
    %90 = math.tanh %89 : vector<8x32xf32>
    %91 = arith.mulf %87, %69 : vector<8x32xf32>
    %92 = arith.mulf %86, %90 : vector<8x32xf32>
    %93 = arith.addf %91, %92 : vector<8x32xf32>
    %94 = math.tanh %93 : vector<8x32xf32>
    %95 = arith.mulf %88, %94 : vector<8x32xf32>
    %c3_i32 = arith.constant 3 : i32
    %c7_i32_40 = arith.constant 7 : i32
    %96 = arith.subi %c7_i32_40, %c3_i32 : i32
    %97 = arith.select %0, %96, %c3_i32 : i32
    %98 = arith.index_cast %97 : i32 to index
    %c0_41 = arith.constant 0 : index
    %c0_42 = arith.constant 0 : index
    %99 = vector.load %arg7[%98, %c0_41, %c0_42] : memref<8x8x128xf32, #tpu.memory_space<vmem>>, vector<1x8x128xf32>
    %100 = vector.shape_cast %99 : vector<1x8x128xf32> to vector<8x128xf32>
    %101 = arith.truncf %95 : vector<8x32xf32> to vector<8x32xbf16>
    %cst_43 = arith.constant dense<0.000000e+00> : vector<8x128xf32>
    %102 = tpu.matmul %101, %22, %cst_43 {dimension_numbers = #tpu.dot_dimension_numbers<[1], [0], [0], [1], [0, 0, 1, 1], [], []>} : vector<8x32xbf16>, vector<32x128xbf16>, vector<8x128xf32> -> vector<8x128xf32>
    %103 = arith.addf %100, %102 : vector<8x128xf32>
    %104 = vector.extract_strided_slice %103 {offsets = [0, 0], sizes = [8, 96], strides = [1, 1]} : vector<8x128xf32> to vector<8x96xf32>
    %105 = arith.negf %104 : vector<8x96xf32>
    %106 = math.exp %105 : vector<8x96xf32>
    %cst_44 = arith.constant 1.000000e+00 : f32
    %107 = vector.broadcast %cst_44 : f32 to vector<8x96xf32>
    %108 = arith.addf %107, %106 : vector<8x96xf32>
    %109 = arith.divf %107, %108 : vector<8x96xf32>
    %110 = vector.extract_strided_slice %109 {offsets = [0, 0], sizes = [8, 32], strides = [1, 1]} : vector<8x96xf32> to vector<8x32xf32>
    %111 = vector.extract_strided_slice %109 {offsets = [0, 32], sizes = [8, 32], strides = [1, 1]} : vector<8x96xf32> to vector<8x32xf32>
    %112 = vector.extract_strided_slice %109 {offsets = [0, 64], sizes = [8, 32], strides = [1, 1]} : vector<8x96xf32> to vector<8x32xf32>
    %113 = vector.extract_strided_slice %103 {offsets = [0, 96], sizes = [8, 32], strides = [1, 1]} : vector<8x128xf32> to vector<8x32xf32>
    %114 = math.tanh %113 : vector<8x32xf32>
    %115 = arith.mulf %111, %93 : vector<8x32xf32>
    %116 = arith.mulf %110, %114 : vector<8x32xf32>
    %117 = arith.addf %115, %116 : vector<8x32xf32>
    %118 = math.tanh %117 : vector<8x32xf32>
    %119 = arith.mulf %112, %118 : vector<8x32xf32>
    %c4_i32 = arith.constant 4 : i32
    %c7_i32_45 = arith.constant 7 : i32
    %120 = arith.subi %c7_i32_45, %c4_i32 : i32
    %121 = arith.select %0, %120, %c4_i32 : i32
    %122 = arith.index_cast %121 : i32 to index
    %c0_46 = arith.constant 0 : index
    %c0_47 = arith.constant 0 : index
    %123 = vector.load %arg7[%122, %c0_46, %c0_47] : memref<8x8x128xf32, #tpu.memory_space<vmem>>, vector<1x8x128xf32>
    %124 = vector.shape_cast %123 : vector<1x8x128xf32> to vector<8x128xf32>
    %125 = arith.truncf %119 : vector<8x32xf32> to vector<8x32xbf16>
    %cst_48 = arith.constant dense<0.000000e+00> : vector<8x128xf32>
    %126 = tpu.matmul %125, %22, %cst_48 {dimension_numbers = #tpu.dot_dimension_numbers<[1], [0], [0], [1], [0, 0, 1, 1], [], []>} : vector<8x32xbf16>, vector<32x128xbf16>, vector<8x128xf32> -> vector<8x128xf32>
    %127 = arith.addf %124, %126 : vector<8x128xf32>
    %128 = vector.extract_strided_slice %127 {offsets = [0, 0], sizes = [8, 96], strides = [1, 1]} : vector<8x128xf32> to vector<8x96xf32>
    %129 = arith.negf %128 : vector<8x96xf32>
    %130 = math.exp %129 : vector<8x96xf32>
    %cst_49 = arith.constant 1.000000e+00 : f32
    %131 = vector.broadcast %cst_49 : f32 to vector<8x96xf32>
    %132 = arith.addf %131, %130 : vector<8x96xf32>
    %133 = arith.divf %131, %132 : vector<8x96xf32>
    %134 = vector.extract_strided_slice %133 {offsets = [0, 0], sizes = [8, 32], strides = [1, 1]} : vector<8x96xf32> to vector<8x32xf32>
    %135 = vector.extract_strided_slice %133 {offsets = [0, 32], sizes = [8, 32], strides = [1, 1]} : vector<8x96xf32> to vector<8x32xf32>
    %136 = vector.extract_strided_slice %133 {offsets = [0, 64], sizes = [8, 32], strides = [1, 1]} : vector<8x96xf32> to vector<8x32xf32>
    %137 = vector.extract_strided_slice %127 {offsets = [0, 96], sizes = [8, 32], strides = [1, 1]} : vector<8x128xf32> to vector<8x32xf32>
    %138 = math.tanh %137 : vector<8x32xf32>
    %139 = arith.mulf %135, %117 : vector<8x32xf32>
    %140 = arith.mulf %134, %138 : vector<8x32xf32>
    %141 = arith.addf %139, %140 : vector<8x32xf32>
    %142 = math.tanh %141 : vector<8x32xf32>
    %143 = arith.mulf %136, %142 : vector<8x32xf32>
    %c5_i32 = arith.constant 5 : i32
    %c7_i32_50 = arith.constant 7 : i32
    %144 = arith.subi %c7_i32_50, %c5_i32 : i32
    %145 = arith.select %0, %144, %c5_i32 : i32
    %146 = arith.index_cast %145 : i32 to index
    %c0_51 = arith.constant 0 : index
    %c0_52 = arith.constant 0 : index
    %147 = vector.load %arg7[%146, %c0_51, %c0_52] : memref<8x8x128xf32, #tpu.memory_space<vmem>>, vector<1x8x128xf32>
    %148 = vector.shape_cast %147 : vector<1x8x128xf32> to vector<8x128xf32>
    %149 = arith.truncf %143 : vector<8x32xf32> to vector<8x32xbf16>
    %cst_53 = arith.constant dense<0.000000e+00> : vector<8x128xf32>
    %150 = tpu.matmul %149, %22, %cst_53 {dimension_numbers = #tpu.dot_dimension_numbers<[1], [0], [0], [1], [0, 0, 1, 1], [], []>} : vector<8x32xbf16>, vector<32x128xbf16>, vector<8x128xf32> -> vector<8x128xf32>
    %151 = arith.addf %148, %150 : vector<8x128xf32>
    %152 = vector.extract_strided_slice %151 {offsets = [0, 0], sizes = [8, 96], strides = [1, 1]} : vector<8x128xf32> to vector<8x96xf32>
    %153 = arith.negf %152 : vector<8x96xf32>
    %154 = math.exp %153 : vector<8x96xf32>
    %cst_54 = arith.constant 1.000000e+00 : f32
    %155 = vector.broadcast %cst_54 : f32 to vector<8x96xf32>
    %156 = arith.addf %155, %154 : vector<8x96xf32>
    %157 = arith.divf %155, %156 : vector<8x96xf32>
    %158 = vector.extract_strided_slice %157 {offsets = [0, 0], sizes = [8, 32], strides = [1, 1]} : vector<8x96xf32> to vector<8x32xf32>
    %159 = vector.extract_strided_slice %157 {offsets = [0, 32], sizes = [8, 32], strides = [1, 1]} : vector<8x96xf32> to vector<8x32xf32>
    %160 = vector.extract_strided_slice %157 {offsets = [0, 64], sizes = [8, 32], strides = [1, 1]} : vector<8x96xf32> to vector<8x32xf32>
    %161 = vector.extract_strided_slice %151 {offsets = [0, 96], sizes = [8, 32], strides = [1, 1]} : vector<8x128xf32> to vector<8x32xf32>
    %162 = math.tanh %161 : vector<8x32xf32>
    %163 = arith.mulf %159, %141 : vector<8x32xf32>
    %164 = arith.mulf %158, %162 : vector<8x32xf32>
    %165 = arith.addf %163, %164 : vector<8x32xf32>
    %166 = math.tanh %165 : vector<8x32xf32>
    %167 = arith.mulf %160, %166 : vector<8x32xf32>
    %c6_i32 = arith.constant 6 : i32
    %c7_i32_55 = arith.constant 7 : i32
    %168 = arith.subi %c7_i32_55, %c6_i32 : i32
    %169 = arith.select %0, %168, %c6_i32 : i32
    %170 = arith.index_cast %169 : i32 to index
    %c0_56 = arith.constant 0 : index
    %c0_57 = arith.constant 0 : index
    %171 = vector.load %arg7[%170, %c0_56, %c0_57] : memref<8x8x128xf32, #tpu.memory_space<vmem>>, vector<1x8x128xf32>
    %172 = vector.shape_cast %171 : vector<1x8x128xf32> to vector<8x128xf32>
    %173 = arith.truncf %167 : vector<8x32xf32> to vector<8x32xbf16>
    %cst_58 = arith.constant dense<0.000000e+00> : vector<8x128xf32>
    %174 = tpu.matmul %173, %22, %cst_58 {dimension_numbers = #tpu.dot_dimension_numbers<[1], [0], [0], [1], [0, 0, 1, 1], [], []>} : vector<8x32xbf16>, vector<32x128xbf16>, vector<8x128xf32> -> vector<8x128xf32>
    %175 = arith.addf %172, %174 : vector<8x128xf32>
    %176 = vector.extract_strided_slice %175 {offsets = [0, 0], sizes = [8, 96], strides = [1, 1]} : vector<8x128xf32> to vector<8x96xf32>
    %177 = arith.negf %176 : vector<8x96xf32>
    %178 = math.exp %177 : vector<8x96xf32>
    %cst_59 = arith.constant 1.000000e+00 : f32
    %179 = vector.broadcast %cst_59 : f32 to vector<8x96xf32>
    %180 = arith.addf %179, %178 : vector<8x96xf32>
    %181 = arith.divf %179, %180 : vector<8x96xf32>
    %182 = vector.extract_strided_slice %181 {offsets = [0, 0], sizes = [8, 32], strides = [1, 1]} : vector<8x96xf32> to vector<8x32xf32>
    %183 = vector.extract_strided_slice %181 {offsets = [0, 32], sizes = [8, 32], strides = [1, 1]} : vector<8x96xf32> to vector<8x32xf32>
    %184 = vector.extract_strided_slice %181 {offsets = [0, 64], sizes = [8, 32], strides = [1, 1]} : vector<8x96xf32> to vector<8x32xf32>
    %185 = vector.extract_strided_slice %175 {offsets = [0, 96], sizes = [8, 32], strides = [1, 1]} : vector<8x128xf32> to vector<8x32xf32>
    %186 = math.tanh %185 : vector<8x32xf32>
    %187 = arith.mulf %183, %165 : vector<8x32xf32>
    %188 = arith.mulf %182, %186 : vector<8x32xf32>
    %189 = arith.addf %187, %188 : vector<8x32xf32>
    %190 = math.tanh %189 : vector<8x32xf32>
    %191 = arith.mulf %184, %190 : vector<8x32xf32>
    %c7_i32_60 = arith.constant 7 : i32
    %c7_i32_61 = arith.constant 7 : i32
    %192 = arith.subi %c7_i32_61, %c7_i32_60 : i32
    %193 = arith.select %0, %192, %c7_i32_60 : i32
    %194 = arith.index_cast %193 : i32 to index
    %c0_62 = arith.constant 0 : index
    %c0_63 = arith.constant 0 : index
    %195 = vector.load %arg7[%194, %c0_62, %c0_63] : memref<8x8x128xf32, #tpu.memory_space<vmem>>, vector<1x8x128xf32>
    %196 = vector.shape_cast %195 : vector<1x8x128xf32> to vector<8x128xf32>
    %197 = arith.truncf %191 : vector<8x32xf32> to vector<8x32xbf16>
    %cst_64 = arith.constant dense<0.000000e+00> : vector<8x128xf32>
    %198 = tpu.matmul %197, %22, %cst_64 {dimension_numbers = #tpu.dot_dimension_numbers<[1], [0], [0], [1], [0, 0, 1, 1], [], []>} : vector<8x32xbf16>, vector<32x128xbf16>, vector<8x128xf32> -> vector<8x128xf32>
    %199 = arith.addf %196, %198 : vector<8x128xf32>
    %200 = vector.extract_strided_slice %199 {offsets = [0, 0], sizes = [8, 96], strides = [1, 1]} : vector<8x128xf32> to vector<8x96xf32>
    %201 = arith.negf %200 : vector<8x96xf32>
    %202 = math.exp %201 : vector<8x96xf32>
    %cst_65 = arith.constant 1.000000e+00 : f32
    %203 = vector.broadcast %cst_65 : f32 to vector<8x96xf32>
    %204 = arith.addf %203, %202 : vector<8x96xf32>
    %205 = arith.divf %203, %204 : vector<8x96xf32>
    %206 = vector.extract_strided_slice %205 {offsets = [0, 0], sizes = [8, 32], strides = [1, 1]} : vector<8x96xf32> to vector<8x32xf32>
    %207 = vector.extract_strided_slice %205 {offsets = [0, 32], sizes = [8, 32], strides = [1, 1]} : vector<8x96xf32> to vector<8x32xf32>
    %208 = vector.extract_strided_slice %205 {offsets = [0, 64], sizes = [8, 32], strides = [1, 1]} : vector<8x96xf32> to vector<8x32xf32>
    %209 = vector.extract_strided_slice %199 {offsets = [0, 96], sizes = [8, 32], strides = [1, 1]} : vector<8x128xf32> to vector<8x32xf32>
    %210 = math.tanh %209 : vector<8x32xf32>
    %211 = arith.mulf %207, %189 : vector<8x32xf32>
    %212 = arith.mulf %206, %210 : vector<8x32xf32>
    %213 = arith.addf %211, %212 : vector<8x32xf32>
    %214 = math.tanh %213 : vector<8x32xf32>
    %215 = arith.mulf %208, %214 : vector<8x32xf32>
    %c8_i32 = arith.constant 8 : i32
    %216 = arith.truncf %215 : vector<8x32xf32> to vector<8x32xbf16>
    %c0_66 = arith.constant 0 : index
    %c0_67 = arith.constant 0 : index
    %c0_68 = arith.constant 0 : index
    %217 = vector.load %arg5[%c0_66, %c0_67, %c0_68] : memref<1x32x128xbf16, #tpu.memory_space<vmem>>, vector<1x32x128xbf16>
    %218 = vector.shape_cast %217 : vector<1x32x128xbf16> to vector<32x128xbf16>
    %cst_69 = arith.constant dense<0.000000e+00> : vector<8x128xf32>
    %219 = tpu.matmul %216, %218, %cst_69 {dimension_numbers = #tpu.dot_dimension_numbers<[1], [0], [0], [1], [0, 0, 1, 1], [], []>} : vector<8x32xbf16>, vector<32x128xbf16>, vector<8x128xf32> -> vector<8x128xf32>
    %c0_70 = arith.constant 0 : index
    %c0_71 = arith.constant 0 : index
    %c0_72 = arith.constant 0 : index
    %220 = vector.load %arg6[%c0_70, %c0_71, %c0_72] : memref<1x8x128xf32, #tpu.memory_space<vmem>>, vector<1x8x128xf32>
    %221 = vector.shape_cast %220 : vector<1x8x128xf32> to vector<8x128xf32>
    %222 = vector.shape_cast %219 : vector<8x128xf32> to vector<1x8x128xf32>
    tpu.vector_store %arg6[%c0_70, %c0_71, %c0_72], %222 {strides = array<i32>} : memref<1x8x128xf32, #tpu.memory_space<vmem>>, vector<1x8x128xf32>,
    return
  }
  func.func @transform_0(%arg0: i32) -> (i32, i32, i32, i32) {
    %c0_i32 = arith.constant 0 : i32
    %c0_i32_0 = arith.constant 0 : i32
    %c0_i32_1 = arith.constant 0 : i32
    %c0_i32_2 = arith.constant 0 : i32
    %c0_i32_3 = arith.constant 0 : i32
    return %c0_i32, %c0_i32_0, %c0_i32_1, %c0_i32_2 : i32, i32, i32, i32
  }
  func.func @transform_1(%arg0: i32) -> (i32, i32, i32, i32) {
    %c0_i32 = arith.constant 0 : i32
    %c0_i32_0 = arith.constant 0 : i32
    %c0_i32_1 = arith.constant 0 : i32
    %c0_i32_2 = arith.constant 0 : i32
    return %arg0, %c0_i32, %c0_i32_0, %c0_i32_1 : i32, i32, i32, i32
  }
  func.func @transform_2(%arg0: i32) -> (i32, i32, i32) {
    %c0_i32 = arith.constant 0 : i32
    %c0_i32_0 = arith.constant 0 : i32
    %c0_i32_1 = arith.constant 0 : i32
    return %arg0, %c0_i32, %c0_i32_0 : i32, i32, i32
  }
  func.func @transform_3(%arg0: i32) -> (i32, i32, i32) {
    %c0_i32 = arith.constant 0 : i32
    %c0_i32_0 = arith.constant 0 : i32
    %c0_i32_1 = arith.constant 0 : i32
    return %arg0, %c0_i32, %c0_i32_0 : i32, i32, i32
  }
  func.func @transform_4(%arg0: i32) -> (i32, i32, i32) {
    %c0_i32 = arith.constant 0 : i32
    %c0_i32_0 = arith.constant 0 : i32
    %c0_i32_1 = arith.constant 0 : i32
    return %arg0, %c0_i32, %c0_i32_0 : i32, i32, i32
  }
  func.func @transform_5(%arg0: i32) -> (i32, i32, i32) {
    %c0_i32 = arith.constant 0 : i32
    %c0_i32_0 = arith.constant 0 : i32
    %c0_i32_1 = arith.constant 0 : i32
    return %arg0, %c0_i32, %c0_i32_0 : i32, i32, i32
  }
}

</mosaic_0001>

<bundles_post_ra>
// kernel: rnn_forward.2
= control target key start
LH: loop header
LB: loop body
LE: loop exit
PB: predicated region body
PF: predicated region fallthrough
CT: control target
= control target key end

     0   :  { %s1479_s15 = smov 0   ;;  %s1716_s0 = inlined_call_operand.vmem [shape: bf16[1,8,8,32], index: 0, kind: input, shape index: {}]   ;;  %s1717_s1 = inlined_call_operand.vmem [shape: bf16[2,1,32,128], index: 1, kind: input, shape index: {}]   ;;  %s1718_s2 = inlined_call_operand.vmem [shape: bf16[2,32,128], index: 2, kind: input, shape index: {}]   ;;  %s1719_s3 = inlined_call_operand.vmem [shape: f32[2,1,128], index: 3, kind: input, shape index: {}]   ;;  %s1720_s4 = inlined_call_operand.vmem [shape: bf16[2,8,8,32], index: 4, kind: output, shape index: {}]  }
   0x1 LB: > { %s1485_s16 = sadd.s32 4294967295, %s1447_s15   ;;  %p1178_p0 = scmp.ge.s32.totalorder %s1447_s15, 1  ;;  %s1447_s15 = sphi %s1479_s15, %s14_s15  }
   0x2   : > { %p180_p1 = scmp.lt.s32.totalorder %s1447_s15, 3 }
   0x4   : > { %p181_p2 = pnand %p1178_p0, %p180_p1 }
   0x5   : > { %p214_p3 = scmp.lt.s32.totalorder (!%p181_p2), %s1485_s16, 1  ;;  %v1373_v0 = vld [vmem:[%s1716_s0] sm:$0xff] (!%p181_p2)   ;;  %vm278_vm0 = vcmask (!%p181_p2), 261120   ;;  %v1449_v1 = vmov (!%p181_p2), 0.0   ;;  %vm1450_vm1 = vmmov (!%p181_p2), 0   ;;  %v1374_v6 = vld [vmem:[%s1716_s0 + $0x8] sm:$0xff] (!%p181_p2)  }
   0x6   : > { %184 = sbr.rel (%p181_p2) target bundleno = 5680 (0x1630), region = 36  ;;  %1284 = vmatprep.mubr.msk.bf16.mxu0 (!%p181_p2), %vm278_vm0, %v1373_v0  ;;  %1292 = vmatprep.subr.bf16.mxu1 (!%p181_p2), %v1449_v1  ;;  %v1375_v7 = vld [vmem:[%s1716_s0 + $0x10] sm:$0xff] (!%p181_p2)   ;;  %v1451_v8 = vmov (!%p181_p2), 0   ;;  %v1376_v9 = vld [vmem:[%s1716_s0 + $0x18] sm:$0xff] (!%p181_p2)   ;;  %p233_p4 = scmp.eq.s32.totalorder (!%p181_p2), %s1485_s16, 1  ;;  %vm476_vm2 = vcmask (!%p181_p2), 257024  }
   0x7   : > { %1296 = vmatprep.mubr.msk.bf16.mxu1 (!%p181_p2), %vm1450_vm1, %v1449_v1  ;;  %s1452_s13 = smov (!%p181_p2), 32   ;;  %s1453_s14 = smov (!%p181_p2), 64  }
   0xd   : > { %s1494_s19 = scalar_select %p214_p3, %s1485_s16, 1 }
   0xe   : > { %s1547_s10 = scalar_select %p233_p4, 7, 0 }
   0xf   : > { %s1239_s20 = sshll.u32 %s1494_s19, 4  ;;  %s226_s9 = scalar_lea.vmem %s1719_s3, %s1494_s19 }
  0x10   : > { %s218_s23 = scalar_lea.vmem %s1717_s1, %s1239_s20  ;;  %s223_s26 = scalar_lea.vmem %s1718_s2, %s1239_s20  ;;  %v1195_v10 = vld [vmem:[%s226_s9] ss:$0 sm:$0xff] }
  0x11   : > { %v1369_v2 = vld [vmem:[%s218_s23] sm:$0xff]   ;;  %v1372_v4 = vld [vmem:[%s218_s23 + $0x8] sm:$0xff]   ;;  %s1196_s11 = sshll.u32 %s1547_s10, 3  ;;  %s1241_s16 = sshll.u32 %s1494_s19, 5 }
  0x12   : > { %1280 = vmatprep.subr.bf16.mxu0 %v1369_v2  ;;  %v1507_v3 = vld [vmem:[%s223_s26] sm:$0xff]   ;;  %v1509_v5 = vld [vmem:[%s223_s26 + $0x8] sm:$0xff]   ;;  %s385_s12 = scalar_lea.vmem [#allocation2], %s1196_s11 }
  0x13   : > { %1281 = vmatpush3.bf16.msra.mxu0 %v1369_v2  ;;  %1293 = vmatpush3.bf16.msra.mxu1 %v1507_v3  ;;  %s1566_s17 = scalar_select %p233_p4, 6, 1 }
  0x14   : > { %1282 = vmatprep.subr.bf16.mxu0 %v1372_v4  ;;  %1294 = vmatprep.subr.bf16.mxu1 %v1449_v1  ;;  %s1585_s21 = scalar_select %p233_p4, 5, 2 }
  0x15   : > { %s1202_s18 = sshll.u32 %s1566_s17, 3  ;;  %s1206_s19 = sshll.u32 %s1566_s17, 2 }
  0x16   : > { %s480_s20 = scalar_lea.vmem [#allocation2], %s1202_s18  ;;  %s1207_s22 = sshll.u32 %s1585_s21, 3 }
  0x17   : > { %1283 = vmatpush3.bf16.msra.mxu0 %v1372_v4  ;;  %1295 = vmatpush3.bf16.msra.mxu1 %v1509_v5  ;;  %s564_s23 = scalar_lea.vmem [#allocation2], %s1207_s22 }
  0x18   : > { %1308 = vmatprep.subr.bf16.mxu0 %v1449_v1  ;;  %1300 = vmatprep.subr.bf16.mxu1 %v1449_v1  ;;  %s1604_s24 = scalar_select %p233_p4, 4, 3 }
  0x19   : > { %s1622_s27 = scalar_select %p233_p4, 3, 4 }
  0x1a   : > { %1285 = vmatmul.mubr.msk.bf16.vlgmr.msra.gmra.mrb[0].mxu0 %vm278_vm0, %v1374_v6  ;;  %1297 = vmatmul.mubr.bf16.vlgmr.msra.gmra.mrb[0].mxu1 %v1451_v8  ;;  %s1212_s25 = sshll.u32 %s1604_s24, 3 }
  0x1b   : > { %1288 = vmatprep.mubr.msk.bf16.mxu0 %vm278_vm0, %v1375_v7  ;;  %1301 = vmatpush3.bf16.msra.mxu1 %v1507_v3  ;;  %s648_s26 = scalar_lea.vmem [#allocation2], %s1212_s25  ;;  %s1217_s28 = sshll.u32 %s1622_s27, 3 }
  0x1c   : > { %1304 = vmatprep.mubr.msk.bf16.mxu1 %vm1450_vm1, %v1449_v1  ;;  %1302 = vmatprep.subr.bf16.mxu1 %v1449_v1  ;;  %s732_s29 = scalar_lea.vmem [#allocation2], %s1217_s28  ;;  %s1201_s25 = sshll.u32 %s1547_s10, 2 }
  0x1d   : > { %1309 = vmatpush3.bf16.msra.mxu0 %v1507_v3  ;;  %s1640_s30 = scalar_select %p233_p4, 2, 5 }
  0x1e   : > { %1310 = vmatprep.subr.bf16.mxu0 %v1449_v1  ;;  %s1653_s7 = scalar_select %p233_p4, 1, 6 }
  0x1f   : > { %1303 = vmatpush3.bf16.msra.mxu1 %v1509_v5  ;;  %s1222_s5 = sshll.u32 %s1640_s30, 3  ;;  %s1211_s10 = sshll.u32 %s1585_s21, 2 }
  0x20   : > { %1316 = vmatprep.subr.bf16.mxu1 %v1449_v1  ;;  %s816_s6 = scalar_lea.vmem [#allocation2], %s1222_s5  ;;  %s1227_s8 = sshll.u32 %s1653_s7, 3 }
  0x21   : > { %1311 = vmatpush3.bf16.msra.mxu0 %v1509_v5  ;;  %s900_s9 = scalar_lea.vmem [#allocation2], %s1227_s8  ;;  %s1221_s5 = sshll.u32 %s1622_s27, 2 }
  0x22   : > { %1289 = vmatmul.mubr.msk.bf16.gmra.mrb[4].mxu0 %vm278_vm0, %v1376_v9  ;;  %1324 = vmatprep.subr.bf16.mxu0 %v1449_v1  ;;  %s1663_s11 = scalar_select %p233_p4, 0, 7 }
  0x23   : > { %1312 = vmatprep.mubr.msk.bf16.mxu0 %vm1450_vm1, %v1449_v1  ;;  %s1231_s8 = sshll.u32 %s1653_s7, 2 }
  0xed   : > { %v1286_v11 = vpop.f32.mrb[0].mxu0  ;;  %v436_v14 = vpop.f32.mrb[0].mxu1 }
  0xee   : > { %v365_v12 = vadd.f32 %v1286_v11, %v1195_v10  ;;  %v325_v13 = vpop.f32.mrb[1].mxu0  ;;  %v1298_v17 = vpop.f32.mrb[1].mxu1 }
  0xef   : > { %v363_v15 = vadd.f32 %v1195_v10, %v325_v13  ;;  %v1287_v16 = vpop.f32.mrb[2].mxu0  ;;  %v439_v20 = vpop.f32.mrb[2].mxu1 }
  0xf0   : > { %373 = vst [vmem:[#allocation2 + $0x10] sm:$0xff] %v365_v12  ;;  %v366_v18 = vadd.f32 %v1287_v16, %v1195_v10  ;;  %v328_v19 = vpop.f32.mrb[3].mxu0  ;;  %v1299_v22 = vpop.f32.mrb[3].mxu1 }
  0xf1   : > { %371 = vst [vmem:[#allocation2] sm:$0xff] %v363_v15  ;;  %v364_v21 = vadd.f32 %v1195_v10, %v328_v19 }
  0xf2   : > { %374 = vst [vmem:[#allocation2 + $0x18] sm:$0xff] %v366_v18 }
  0xf3   : > { %372 = vst [vmem:[#allocation2 + $0x8] sm:$0xff] %v364_v21 }
  0xf5   : > { %v1290_v23 = vpop.f32.mrb[4].mxu0 }
  0xf6   : > { %v369_v24 = vadd.f32 %v1290_v23, %v1195_v10  ;;  %v341_v25 = vpop.f32.mrb[5].mxu0 }
  0xf7   : > { %v367_v26 = vadd.f32 %v1195_v10, %v341_v25  ;;  %v1291_v27 = vpop.f32.mrb[6].mxu0 }
  0xf8   : > { %377 = vst [vmem:[#allocation2 + $0x30] sm:$0xff] %v369_v24  ;;  %v370_v28 = vadd.f32 %v1291_v27, %v1195_v10  ;;  %v344_v29 = vpop.f32.mrb[7].mxu0 }
  0xf9   : > { %375 = vst [vmem:[#allocation2 + $0x20] sm:$0xff] %v367_v26  ;;  %v368_v30 = vadd.f32 %v1195_v10, %v344_v29 }
  0xfa   : > { %378 = vst [vmem:[#allocation2 + $0x38] sm:$0xff] %v370_v28 }
  0xfb   : > { %376 = vst [vmem:[#allocation2 + $0x28] sm:$0xff] %v368_v30 }
 0x102   : > { %v386_v31 = vld [vmem:[%s385_s12] sm:$0xff]  ;;  %s1232_s12 = sshll.u32 %s1663_s11, 3 }
 0x103   : > { %v442_v32 = vadd.f32 %v436_v14, %v386_v31  ;;  %v481_v48 = vld [vmem:[%s480_s20] sm:$0xff]  ;;  %s984_s18 = scalar_lea.vmem [#allocation2], %s1232_s12 }
 0x104   : > { %v565_v8 = vld [vmem:[%s564_s23] sm:$0xff]  ;;  %s1679_s23 = scalar_lea.vmem %s1720_s4, %s1241_s16 }
 0x105   : > { %1377 = vtanh.f32 %v442_v32  ;;  %v1199_v34 = vmul.f32 -1.442695, %v442_v32  ;;  %v649_v29 = vld [vmem:[%s648_s26] sm:$0xff]  ;;  %s475_s26 = scalar_lea.vmem %s1679_s23, %s1201_s25  ;;  %s560_s28 = scalar_lea.vmem %s1679_s23, %s1206_s19 }
 0x106   : > { %s812_s21 = scalar_lea.vmem %s1679_s23, %s1221_s5  ;;  %s980_s27 = scalar_lea.vmem %s1679_s23, %s1231_s8 }
 0x107   : > { %1379 = vpow2.f32 %v1199_v34 }
 0x10f   : > { %v1378_v33 = vpop.eup %1377 }
 0x110   : > { %452 = vrot.lane.b32.xlu0 %v1378_v33, %s1452_s13 }
 0x111   : > { %v1380_v35 = vpop.eup %1379 }
 0x112   : > { %v446_v36 = vadd.f32 1.0, %v1380_v35 }
 0x114   : > { %1381 = vrcp.f32 %v446_v36 }
 0x11e   : > { %v1382_v37 = vpop.eup %1381 }
 0x11f   : > { %v450_v40 = vmul.f32 0.0, %v1382_v37 }
 0x182   : > { %v453_v38 = vpop.permute.xlu0 %452 }
 0x183   : > { %v455_v39 = vmul.f32 %v1382_v37, %v453_v38 }
 0x185   : > { %457 = vrot.lane.b32.xlu0 %v455_v39, %s1452_s13 }
 0x1f7   : > { %v458_v41 = vpop.permute.xlu0 %457 }
 0x1f8   : > { %v460_v42 = vadd.f32 %v458_v41, %v450_v40 }
 0x1fa   : > { %1383 = vtanh.f32 %v460_v42 }
 0x204   : > { %v1384_v43 = vpop.eup %1383 }
 0x205   : > { %463 = vrot.lane.b32.xlu1 %v1384_v43, %s1452_s13 }
 0x277   : > { %v464_v44 = vpop.permute.xlu1 %463 }
 0x278   : > { %v466_v45 = vmul.f32 %v1382_v37, %v464_v44 }
 0x27a   : > { %v1553_v46 = vpack.c.bf16 %v466_v45, %v466_v45 }
 0x27c   : > { %482 = vrot.lane.b32.xlu1 %v1553_v46, %s1453_s14 }
 0x2ee   : > { %v483_v47 = vpop.permute.xlu1 %482 }
 0x2ef   : > { %1305 = vmatmul.mubr.msk.bf16.vlgmr.msra.gmra.mrb[4].mxu1 %vm278_vm0, %v483_v47 }
 0x2f0   : > { %1317 = vmatpush3.bf16.msra.mxu1 %v1507_v3  ;;  %1320 = vmatprep.mubr.msk.bf16.mxu1 %vm1450_vm1, %v1449_v1 }
 0x2f1   : > { %1318 = vmatprep.subr.bf16.mxu1 %v1449_v1 }
 0x2f4   : > { %1319 = vmatpush3.bf16.msra.mxu1 %v1509_v5 }
 0x2f5   : > { %1332 = vmatprep.subr.bf16.mxu1 %v1449_v1 }
 0x3c2   : > { %v521_v49 = vpop.f32.mrb[4].mxu1 }
 0x3c3   : > { %v527_v50 = vadd.f32 %v521_v49, %v481_v48  ;;  %v1306_v51 = vpop.f32.mrb[5].mxu1 }
 0x3c4   : > { %v524_v52 = vpop.f32.mrb[6].mxu1  ;;  %v733_v51 = vld [vmem:[%s732_s29] sm:$0xff]  ;;  %s1216_s29 = sshll.u32 %s1604_s24, 2 }
 0x3c5   : > { %1385 = vtanh.f32 %v527_v50  ;;  %v1307_v53 = vpop.f32.mrb[7].mxu1  ;;  %v1204_v55 = vmul.f32 -1.442695, %v527_v50  ;;  %s728_s17 = scalar_lea.vmem %s1679_s23, %s1216_s29 }
 0x3c7   : > { %1387 = vpow2.f32 %v1204_v55 }
 0x3cf   : > { %v1386_v54 = vpop.eup %1385 }
 0x3d0   : > { %537 = vrot.lane.b32.xlu0 %v1386_v54, %s1452_s13 }
 0x3d1   : > { %v1388_v56 = vpop.eup %1387 }
 0x3d2   : > { %v531_v57 = vadd.f32 1.0, %v1388_v56 }
 0x3d4   : > { %1389 = vrcp.f32 %v531_v57 }
 0x3de   : > { %v1390_v58 = vpop.eup %1389 }
 0x3df   : > { %v535_v61 = vmul.f32 %v1390_v58, %v460_v42 }
 0x442   : > { %v538_v59 = vpop.permute.xlu0 %537 }
 0x443   : > { %v540_v60 = vmul.f32 %v1390_v58, %v538_v59 }
 0x445   : > { %542 = vrot.lane.b32.xlu1 %v540_v60, %s1452_s13 }
 0x4b7   : > { %v543_v62 = vpop.permute.xlu1 %542 }
 0x4b8   : > { %v545_v63 = vadd.f32 %v543_v62, %v535_v61 }
 0x4ba   : > { %1391 = vtanh.f32 %v545_v63 }
 0x4c4   : > { %v1392_v0 = vpop.eup %1391 }
 0x4c5   : > { %548 = vrot.lane.b32.xlu0 %v1392_v0, %s1452_s13 }
 0x537   : > { %v549_v2 = vpop.permute.xlu0 %548 }
 0x538   : > { %v551_v4 = vmul.f32 %v1390_v58, %v549_v2 }
 0x53a   : > { %v1572_v6 = vpack.c.bf16 %v551_v4, %v551_v4 }
 0x53c   : > { %566 = vrot.lane.b32.xlu1 %v1572_v6, %s1453_s14 }
 0x5ae   : > { %v567_v7 = vpop.permute.xlu1 %566 }
 0x5af   : > { %1313 = vmatmul.mubr.msk.bf16.vlgmr.msra.gmra.mrb[8].mxu0 %vm278_vm0, %v567_v7 }
 0x5b0   : > { %1325 = vmatpush3.bf16.msra.mxu0 %v1507_v3  ;;  %1328 = vmatprep.mubr.msk.bf16.mxu0 %vm1450_vm1, %v1449_v1 }
 0x5b1   : > { %1326 = vmatprep.subr.bf16.mxu0 %v1449_v1 }
 0x5b4   : > { %1327 = vmatpush3.bf16.msra.mxu0 %v1509_v5 }
 0x5b5   : > { %1340 = vmatprep.subr.bf16.mxu0 %v1449_v1 }
 0x682   : > { %v605_v9 = vpop.f32.mrb[8].mxu0 }
 0x683   : > { %v611_v10 = vadd.f32 %v605_v9, %v565_v8  ;;  %v1314_v11 = vpop.f32.mrb[9].mxu0 }
 0x684   : > { %v608_v12 = vpop.f32.mrb[10].mxu0 }
 0x685   : > { %1393 = vtanh.f32 %v611_v10  ;;  %v1315_v13 = vpop.f32.mrb[11].mxu0  ;;  %v1209_v15 = vmul.f32 -1.442695, %v611_v10  ;;  %v817_v12 = vld [vmem:[%s816_s6] sm:$0xff]  ;;  %s1226_s6 = sshll.u32 %s1640_s30, 2 }
 0x686   : > { %s896_s24 = scalar_lea.vmem %s1679_s23, %s1226_s6 }
 0x687   : > { %1395 = vpow2.f32 %v1209_v15 }
 0x68f   : > { %v1394_v14 = vpop.eup %1393 }
 0x690   : > { %621 = vrot.lane.b32.xlu0 %v1394_v14, %s1452_s13 }
 0x691   : > { %v1396_v16 = vpop.eup %1395 }
 0x692   : > { %v615_v17 = vadd.f32 1.0, %v1396_v16 }
 0x694   : > { %1397 = vrcp.f32 %v615_v17 }
 0x69e   : > { %v1398_v18 = vpop.eup %1397 }
 0x69f   : > { %v619_v21 = vmul.f32 %v1398_v18, %v545_v63 }
 0x702   : > { %v622_v19 = vpop.permute.xlu0 %621 }
 0x703   : > { %v624_v20 = vmul.f32 %v1398_v18, %v622_v19 }
 0x705   : > { %626 = vrot.lane.b32.xlu1 %v624_v20, %s1452_s13 }
 0x777   : > { %v627_v22 = vpop.permute.xlu1 %626 }
 0x778   : > { %v629_v23 = vadd.f32 %v627_v22, %v619_v21 }
 0x77a   : > { %1399 = vtanh.f32 %v629_v23 }
 0x784   : > { %v1400_v24 = vpop.eup %1399 }
 0x785   : > { %632 = vrot.lane.b32.xlu0 %v1400_v24, %s1452_s13 }
 0x7f7   : > { %v633_v25 = vpop.permute.xlu0 %632 }
 0x7f8   : > { %v635_v26 = vmul.f32 %v1398_v18, %v633_v25 }
 0x7fa   : > { %v1591_v27 = vpack.c.bf16 %v635_v26, %v635_v26 }
 0x7fc   : > { %650 = vrot.lane.b32.xlu1 %v1591_v27, %s1453_s14 }
 0x86e   : > { %v651_v28 = vpop.permute.xlu1 %650 }
 0x86f   : > { %1321 = vmatmul.mubr.msk.bf16.vlgmr.msra.gmra.mrb[8].mxu1 %vm278_vm0, %v651_v28 }
 0x870   : > { %1333 = vmatpush3.bf16.msra.mxu1 %v1507_v3  ;;  %1336 = vmatprep.mubr.msk.bf16.mxu1 %vm1450_vm1, %v1449_v1 }
 0x871   : > { %1334 = vmatprep.subr.bf16.mxu1 %v1449_v1 }
 0x874   : > { %1335 = vmatpush3.bf16.msra.mxu1 %v1509_v5 }
 0x875   : > { %1348 = vmatprep.subr.bf16.mxu1 %v1449_v1 }
 0x942   : > { %v689_v30 = vpop.f32.mrb[8].mxu1 }
 0x943   : > { %v695_v31 = vadd.f32 %v689_v30, %v649_v29  ;;  %v1322_v32 = vpop.f32.mrb[9].mxu1 }
 0x944   : > { %v692_v33 = vpop.f32.mrb[10].mxu1 }
 0x945   : > { %1401 = vtanh.f32 %v695_v31  ;;  %v1323_v34 = vpop.f32.mrb[11].mxu1  ;;  %v1214_v36 = vmul.f32 -1.442695, %v695_v31  ;;  %v901_v31 = vld [vmem:[%s900_s9] sm:$0xff] }
 0x947   : > { %1403 = vpow2.f32 %v1214_v36 }
 0x94f   : > { %v1402_v35 = vpop.eup %1401 }
 0x950   : > { %705 = vrot.lane.b32.xlu0 %v1402_v35, %s1452_s13 }
 0x951   : > { %v1404_v37 = vpop.eup %1403 }
 0x952   : > { %v699_v38 = vadd.f32 1.0, %v1404_v37 }
 0x954   : > { %1405 = vrcp.f32 %v699_v38 }
 0x95e   : > { %v1406_v39 = vpop.eup %1405 }
 0x95f   : > { %v703_v42 = vmul.f32 %v1406_v39, %v629_v23 }
 0x9c2   : > { %v706_v40 = vpop.permute.xlu0 %705 }
 0x9c3   : > { %v708_v41 = vmul.f32 %v1406_v39, %v706_v40 }
 0x9c5   : > { %710 = vrot.lane.b32.xlu1 %v708_v41, %s1452_s13 }
 0xa37   : > { %v711_v43 = vpop.permute.xlu1 %710 }
 0xa38   : > { %v713_v44 = vadd.f32 %v711_v43, %v703_v42 }
 0xa3a   : > { %1407 = vtanh.f32 %v713_v44 }
 0xa44   : > { %v1408_v45 = vpop.eup %1407 }
 0xa45   : > { %716 = vrot.lane.b32.xlu0 %v1408_v45, %s1452_s13 }
 0xab7   : > { %v717_v47 = vpop.permute.xlu0 %716 }
 0xab8   : > { %v719_v48 = vmul.f32 %v1406_v39, %v717_v47 }
 0xaba   : > { %v1610_v49 = vpack.c.bf16 %v719_v48, %v719_v48 }
 0xabc   : > { %734 = vrot.lane.b32.xlu1 %v1610_v49, %s1453_s14 }
 0xb2e   : > { %v735_v50 = vpop.permute.xlu1 %734 }
 0xb2f   : > { %1329 = vmatmul.mubr.msk.bf16.vlgmr.msra.gmra.mrb[12].mxu0 %vm278_vm0, %v735_v50 }
 0xb30   : > { %1341 = vmatpush3.bf16.msra.mxu0 %v1507_v3  ;;  %1344 = vmatprep.mubr.msk.bf16.mxu0 %vm1450_vm1, %v1449_v1 }
 0xb31   : > { %1342 = vmatprep.subr.bf16.mxu0 %v1449_v1 }
 0xb34   : > { %1343 = vmatpush3.bf16.msra.mxu0 %v1509_v5 }
 0xc02   : > { %v773_v52 = vpop.f32.mrb[12].mxu0 }
 0xc03   : > { %v779_v53 = vadd.f32 %v773_v52, %v733_v51  ;;  %v1330_v54 = vpop.f32.mrb[13].mxu0 }
 0xc04   : > { %v776_v55 = vpop.f32.mrb[14].mxu0  ;;  %v985_v54 = vld [vmem:[%s984_s18] sm:$0xff] }
 0xc05   : > { %1409 = vtanh.f32 %v779_v53  ;;  %v1331_v56 = vpop.f32.mrb[15].mxu0  ;;  %v1219_v58 = vmul.f32 -1.442695, %v779_v53 }
 0xc07   : > { %1411 = vpow2.f32 %v1219_v58 }
 0xc0f   : > { %v1410_v57 = vpop.eup %1409 }
 0xc10   : > { %789 = vrot.lane.b32.xlu0 %v1410_v57, %s1452_s13 }
 0xc11   : > { %v1412_v59 = vpop.eup %1411 }
 0xc12   : > { %v783_v60 = vadd.f32 1.0, %v1412_v59 }
 0xc14   : > { %1413 = vrcp.f32 %v783_v60 }
 0xc1e   : > { %v1414_v61 = vpop.eup %1413 }
 0xc1f   : > { %v787_v0 = vmul.f32 %v1414_v61, %v713_v44 }
 0xc82   : > { %v790_v62 = vpop.permute.xlu0 %789 }
 0xc83   : > { %v792_v63 = vmul.f32 %v1414_v61, %v790_v62 }
 0xc85   : > { %794 = vrot.lane.b32.xlu1 %v792_v63, %s1452_s13 }
 0xcf7   : > { %v795_v2 = vpop.permute.xlu1 %794 }
 0xcf8   : > { %v797_v4 = vadd.f32 %v795_v2, %v787_v0 }
 0xcfa   : > { %1415 = vtanh.f32 %v797_v4 }
 0xd04   : > { %v1416_v7 = vpop.eup %1415 }
 0xd05   : > { %800 = vrot.lane.b32.xlu0 %v1416_v7, %s1452_s13 }
 0xd77   : > { %v801_v8 = vpop.permute.xlu0 %800 }
 0xd78   : > { %v803_v9 = vmul.f32 %v1414_v61, %v801_v8 }
 0xd7a   : > { %v1628_v10 = vpack.c.bf16 %v803_v9, %v803_v9 }
 0xd7c   : > { %818 = vrot.lane.b32.xlu1 %v1628_v10, %s1453_s14 }
 0xdee   : > { %v819_v11 = vpop.permute.xlu1 %818 }
 0xdef   : > { %1337 = vmatmul.mubr.msk.bf16.vlgmr.msra.gmra.mrb[12].mxu1 %vm278_vm0, %v819_v11 }
 0xdf0   : > { %1349 = vmatpush3.bf16.msra.mxu1 %v1507_v3  ;;  %1352 = vmatprep.mubr.msk.bf16.mxu1 %vm1450_vm1, %v1449_v1 }
 0xdf1   : > { %1350 = vmatprep.subr.bf16.mxu1 %v1449_v1 }
 0xdf4   : > { %1351 = vmatpush3.bf16.msra.mxu1 %v1509_v5 }
 0xec2   : > { %v857_v13 = vpop.f32.mrb[12].mxu1 }
 0xec3   : > { %v863_v14 = vadd.f32 %v857_v13, %v817_v12  ;;  %v1338_v15 = vpop.f32.mrb[13].mxu1 }
 0xec4   : > { %v860_v16 = vpop.f32.mrb[14].mxu1 }
 0xec5   : > { %1417 = vtanh.f32 %v863_v14  ;;  %v1339_v3 = vpop.f32.mrb[15].mxu1  ;;  %v1224_v18 = vmul.f32 -1.442695, %v863_v14 }
 0xec7   : > { %1419 = vpow2.f32 %v1224_v18 }
 0xecf   : > { %v1418_v17 = vpop.eup %1417 }
 0xed0   : > { %873 = vrot.lane.b32.xlu0 %v1418_v17, %s1452_s13 }
 0xed1   : > { %v1420_v1 = vpop.eup %1419 }
 0xed2   : > { %v867_v5 = vadd.f32 1.0, %v1420_v1 }
 0xed4   : > { %1421 = vrcp.f32 %v867_v5 }
 0xede   : > { %v1422_v19 = vpop.eup %1421 }
 0xedf   : > { %v871_v22 = vmul.f32 %v1422_v19, %v797_v4 }
 0xf42   : > { %v874_v20 = vpop.permute.xlu0 %873 }
 0xf43   : > { %v876_v21 = vmul.f32 %v1422_v19, %v874_v20 }
 0xf45   : > { %878 = vrot.lane.b32.xlu1 %v876_v21, %s1452_s13 }
 0xfb7   : > { %v879_v23 = vpop.permute.xlu1 %878 }
 0xfb8   : > { %v881_v24 = vadd.f32 %v879_v23, %v871_v22 }
 0xfba   : > { %1423 = vtanh.f32 %v881_v24 }
 0xfc4   : > { %v1424_v25 = vpop.eup %1423 }
 0xfc5   : > { %884 = vrot.lane.b32.xlu0 %v1424_v25, %s1452_s13 }
0x1037   : > { %v885_v26 = vpop.permute.xlu0 %884 }
0x1038   : > { %v887_v28 = vmul.f32 %v1422_v19, %v885_v26 }
0x103a   : > { %v1646_v29 = vpack.c.bf16 %v887_v28, %v887_v28 }
0x103c   : > { %902 = vrot.lane.b32.xlu1 %v1646_v29, %s1453_s14 }
0x10ae   : > { %v903_v30 = vpop.permute.xlu1 %902 }
0x10af   : > { %1345 = vmatmul.mubr.msk.bf16.vlgmr.msra.gmra.mrb[16].mxu0 %vm278_vm0, %v903_v30 }
0x1182   : > { %v941_v32 = vpop.f32.mrb[16].mxu0 }
0x1183   : > { %v947_v33 = vadd.f32 %v941_v32, %v901_v31  ;;  %v1346_v34 = vpop.f32.mrb[17].mxu0 }
0x1184   : > { %v944_v35 = vpop.f32.mrb[18].mxu0 }
0x1185   : > { %1425 = vtanh.f32 %v947_v33  ;;  %v1347_v36 = vpop.f32.mrb[19].mxu0  ;;  %v1229_v38 = vmul.f32 -1.442695, %v947_v33 }
0x1187   : > { %1427 = vpow2.f32 %v1229_v38 }
0x118f   : > { %v1426_v37 = vpop.eup %1425 }
0x1190   : > { %957 = vrot.lane.b32.xlu0 %v1426_v37, %s1452_s13 }
0x1191   : > { %v1428_v39 = vpop.eup %1427 }
0x1192   : > { %v951_v40 = vadd.f32 1.0, %v1428_v39 }
0x1194   : > { %1429 = vrcp.f32 %v951_v40 }
0x119e   : > { %v1430_v41 = vpop.eup %1429 }
0x119f   : > { %v955_v44 = vmul.f32 %v1430_v41, %v881_v24 }
0x1202   : > { %v958_v42 = vpop.permute.xlu0 %957 }
0x1203   : > { %v960_v43 = vmul.f32 %v1430_v41, %v958_v42 }
0x1205   : > { %962 = vrot.lane.b32.xlu1 %v960_v43, %s1452_s13 }
0x1277   : > { %v963_v45 = vpop.permute.xlu1 %962 }
0x1278   : > { %v965_v47 = vadd.f32 %v963_v45, %v955_v44 }
0x127a   : > { %1431 = vtanh.f32 %v965_v47 }
0x1284   : > { %v1432_v48 = vpop.eup %1431 }
0x1285   : > { %968 = vrot.lane.b32.xlu0 %v1432_v48, %s1452_s13 }
0x12f7   : > { %v969_v50 = vpop.permute.xlu0 %968 }
0x12f8   : > { %v971_v51 = vmul.f32 %v1430_v41, %v969_v50 }
0x12fa   : > { %v972_v52 = vpack.c.bf16 %v971_v51, %v971_v51 }
0x12fc   : > { %986 = vrot.lane.b32.xlu1 %v972_v52, %s1453_s14 }
0x136e   : > { %v987_v53 = vpop.permute.xlu1 %986 }
0x136f   : > { %1353 = vmatmul.mubr.msk.bf16.vlgmr.msra.gmra.mrb[16].mxu1 %vm278_vm0, %v987_v53 }
0x1442   : > { %v1025_v55 = vpop.f32.mrb[16].mxu1 }
0x1443   : > { %v1031_v56 = vadd.f32 %v1025_v55, %v985_v54  ;;  %v1354_v57 = vpop.f32.mrb[17].mxu1 }
0x1444   : > { %v1028_v58 = vpop.f32.mrb[18].mxu1 }
0x1445   : > { %1433 = vtanh.f32 %v1031_v56  ;;  %v1355_v59 = vpop.f32.mrb[19].mxu1  ;;  %v1234_v61 = vmul.f32 -1.442695, %v1031_v56 }
0x1447   : > { %1435 = vpow2.f32 %v1234_v61 }
0x144f   : > { %v1434_v60 = vpop.eup %1433 }
0x1450   : > { %1041 = vrot.lane.b32.xlu0 %v1434_v60, %s1452_s13 }
0x1451   : > { %v1436_v62 = vpop.eup %1435 }
0x1452   : > { %v1035_v63 = vadd.f32 1.0, %v1436_v62 }
0x1454   : > { %1437 = vrcp.f32 %v1035_v63 }
0x145e   : > { %v1438_v0 = vpop.eup %1437 }
0x145f   : > { %v1039_v7 = vmul.f32 %v1438_v0, %v965_v47 }
0x14c2   : > { %v1042_v2 = vpop.permute.xlu0 %1041 }
0x14c3   : > { %v1044_v4 = vmul.f32 %v1438_v0, %v1042_v2 }
0x14c5   : > { %1046 = vrot.lane.b32.xlu1 %v1044_v4, %s1452_s13 }
0x14c9   : > { %471 = vrot.lane.b32.xlu1 %v1553_v46, %s1453_s14 }
0x14cd   : > { %640 = vrot.lane.b32.xlu1 %v1591_v27, %s1453_s14 }
0x14d1   : > { %808 = vrot.lane.b32.xlu1 %v1628_v10, %s1453_s14 }
0x14d5   : > { %976 = vrot.lane.b32.xlu1 %v972_v52, %s1453_s14 }
0x1537   : > { %v1047_v46 = vpop.permute.xlu1 %1046 }
0x1538   : > { %v1049_v8 = vadd.f32 %v1047_v46, %v1039_v7 }
0x153a   : > { %1439 = vtanh.f32 %v1049_v8 }
0x153b   : > { %v472_v27 = vpop.permute.xlu1 %471 }
0x153c   : > { %477 = vst.msk [vmem:[%s475_s26] sm:$0xf] %vm476_vm2, %v472_v27 }
0x153f   : > { %v641_v11 = vpop.permute.xlu1 %640 }
0x1544   : > { %v1440_v9 = vpop.eup %1439 }
0x1545   : > { %1052 = vrot.lane.b32.xlu0 %v1440_v9, %s1452_s13  ;;  %s644_s13 = scalar_lea.vmem %s1679_s23, %s1211_s10 }
0x1549   : > { %556 = vrot.lane.b32.xlu0 %v1572_v6, %s1453_s14 }
0x154d   : > { %724 = vrot.lane.b32.xlu0 %v1610_v49, %s1453_s14  ;;  %v809_v49 = vpop.permute.xlu1 %808 }
0x1551   : > { %892 = vrot.lane.b32.xlu0 %v1646_v29, %s1453_s14  ;;  %v977_v16 = vpop.permute.xlu1 %976 }
0x15b7   : > { %v1053_v10 = vpop.permute.xlu0 %1052 }
0x15b8   : > { %v1055_v12 = vmul.f32 %v1438_v0, %v1053_v10 }
0x15ba   : > { %v1249_v6 = vpack.c.bf16 %v1055_v12, %v1055_v12 }
0x15bb   : > { %v557_v13 = vpop.permute.xlu0 %556 }
0x15bc   : > { %561 = vst.msk [vmem:[%s560_s28] sm:$0xf] %vm476_vm2, %v557_v13  ;;  %1060 = vrot.lane.b32.xlu0 %v1249_v6, %s1453_s14  ;;  %s1236_s14 = sshll.u32 %s1663_s11, 2 }
0x15bd   : > { %645 = vst.msk [vmem:[%s644_s13] sm:$0xf] %vm476_vm2, %v641_v11  ;;  %s1064_s9 = scalar_lea.vmem %s1679_s23, %s1236_s14 }
0x15bf   : > { %v725_v14 = vpop.permute.xlu0 %724 }
0x15c0   : > { %729 = vst.msk [vmem:[%s728_s17] sm:$0xf] %vm476_vm2, %v725_v14 }
0x15c1   : > { %813 = vst.msk [vmem:[%s812_s21] sm:$0xf] %vm476_vm2, %v809_v49 }
0x15c3   : > { %v893_v15 = vpop.permute.xlu0 %892 }
0x15c4   : > { %897 = vst.msk [vmem:[%s896_s24] sm:$0xf] %vm476_vm2, %v893_v15 }
0x15c5   : > { %981 = vst.msk [vmem:[%s980_s27] sm:$0xf] %vm476_vm2, %v977_v16 }
0x162e   : > { %v1061_v3 = vpop.permute.xlu0 %1060 }
0x162f   : > { %1065 = vst.msk [vmem:[%s1064_s9] sm:$0xf] %vm476_vm2, %v1061_v3 }
0x1630 PF: > { %s14_s15 = sadd.s32 1, %s1447_s15  }
0x1631   : > { %p11_p5 = scmp.ge.s32.totalorder %s14_s15, 4  }
0x1633   :  { %13 = sbr.rel (!%p11_p5) target bundleno = 1 (0x1), region = 88 }

// kernel: rnn_forward.3
= control target key start
LH: loop header
LB: loop body
LE: loop exit
PB: predicated region body
PF: predicated region fallthrough
CT: control target
= control target key end

     0   :  { %s1690_s18 = smov 0   ;;  %s1875_s0 = inlined_call_operand.vmem [shape: bf16[2,8,8,32], index: 0, kind: input, shape index: {}]   ;;  %s1876_s1 = inlined_call_operand.vmem [shape: bf16[2,2,32,128], index: 1, kind: input, shape index: {}]   ;;  %s1877_s2 = inlined_call_operand.vmem [shape: bf16[2,32,128], index: 2, kind: input, shape index: {}]   ;;  %s1878_s3 = inlined_call_operand.vmem [shape: f32[2,1,128], index: 3, kind: input, shape index: {}]   ;;  %s1879_s4 = inlined_call_operand.vmem [shape: bf16[2,32,128], index: 4, kind: input, shape index: {}]   ;;  %s1880_s5 = inlined_call_operand.vmem [shape: f32[2,8,128], index: 5, kind: output, shape index: {}]  }
   0x1 LB: > { %s1696_s19 = sadd.s32 4294967295, %s1653_s18   ;;  %p1337_p0 = scmp.ge.s32.totalorder %s1653_s18, 1  ;;  %s1653_s18 = sphi %s1690_s18, %s15_s18  }
   0x2   : > { %p215_p1 = scmp.lt.s32.totalorder %s1653_s18, 3 }
   0x4   : > { %p216_p2 = pnand %p1337_p0, %p215_p1 }
   0x5   : > { %p255_p3 = scmp.lt.s32.totalorder (!%p216_p2), %s1696_s19, 1  ;;  %v1569_v0 = vld [vmem:[%s1875_s0 + $0x20] sm:$0xff] (!%p216_p2)   ;;  %vm337_vm0 = vcmask (!%p216_p2), 261120   ;;  %v1655_v1 = vmov (!%p216_p2), 0.0   ;;  %vm1656_vm1 = vmmov (!%p216_p2), 0   ;;  %v1570_v5 = vld [vmem:[%s1875_s0 + $0x28] sm:$0xff] (!%p216_p2)  }
   0x6   : > { %219 = sbr.rel (%p216_p2) target bundleno = 5910 (0x1716), region = 40  ;;  %1454 = vmatprep.mubr.msk.bf16.mxu0 (!%p216_p2), %vm337_vm0, %v1569_v0  ;;  %1474 = vmatprep.subr.bf16.mxu1 (!%p216_p2), %v1655_v1  ;;  %v1572_v6 = vld [vmem:[%s1875_s0 + $0x30] sm:$0xff] (!%p216_p2)   ;;  %v1573_v10 = vld [vmem:[%s1875_s0 + $0x38] sm:$0xff] (!%p216_p2)   ;;  %v1575_v11 = vld [vmem:[%s1875_s0] sm:$0xff] (!%p216_p2)   ;;  %v1657_v12 = vmov (!%p216_p2), 0   ;;  %p278_p4 = scmp.eq.s32.totalorder (!%p216_p2), %s1696_s19, 1 }
   0x7   : > { %1478 = vmatprep.mubr.msk.bf16.mxu1 (!%p216_p2), %vm1656_vm1, %v1655_v1  ;;  %v1576_v13 = vld [vmem:[%s1875_s0 + $0x8] sm:$0xff] (!%p216_p2)   ;;  %v1577_v14 = vld [vmem:[%s1875_s0 + $0x10] sm:$0xff] (!%p216_p2)   ;;  %v1578_v15 = vld [vmem:[%s1875_s0 + $0x18] sm:$0xff] (!%p216_p2)   ;;  %s1659_s6 = smov (!%p216_p2), 64  }
   0xd   : > { %s1705_s22 = scalar_select %p255_p3, %s1696_s19, 1 }
   0xe   : > { %s635_s7 = scalar_select %p278_p4, 6, 1 }
   0xf   : > { %s1408_s23 = sshll.u32 %s1705_s22, 5  ;;  %s1409_s27 = sshll.u32 %s1705_s22, 4 }
  0x10   : > { %s259_s26 = scalar_lea.vmem %s1876_s1, %s1408_s23  ;;  %s264_s30 = scalar_lea.vmem %s1877_s2, %s1409_s27 }
  0x11   : > { %v1567_v2 = vld [vmem:[%s259_s26 + $0x10] sm:$0xff]   ;;  %v1568_v3 = vld [vmem:[%s259_s26 + $0x18] sm:$0xff]   ;;  %v1571_v4 = vld [vmem:[%s259_s26] sm:$0xff]   ;;  %s267_s25 = scalar_lea.vmem %s1878_s3, %s1705_s22  ;;  %s1382_s8 = sshll.u32 %s635_s7, 3 }
  0x12   : > { %1450 = vmatprep.subr.bf16.mxu0 %v1567_v2  ;;  %v1727_v7 = vld [vmem:[%s264_s30] sm:$0xff]   ;;  %v1574_v8 = vld [vmem:[%s259_s26 + $0x8] sm:$0xff]   ;;  %s551_s26 = scalar_select %p278_p4, 7, 0 }
  0x13   : > { %1451 = vmatpush3.bf16.msra.mxu0 %v1567_v2  ;;  %1475 = vmatpush3.bf16.msra.mxu1 %v1727_v7  ;;  %v1730_v9 = vld [vmem:[%s264_s30 + $0x8] sm:$0xff]   ;;  %v1377_v20 = vld [vmem:[%s267_s25] ss:$0 sm:$0xff]  ;;  %s1658_s30 = smov 32   ;;  %s637_s9 = scalar_lea.vmem [#allocation2], %s1382_s8 }
  0x14   : > { %1452 = vmatprep.subr.bf16.mxu0 %v1568_v3  ;;  %1476 = vmatprep.subr.bf16.mxu1 %v1655_v1  ;;  %s1378_s28 = sshll.u32 %s551_s26, 3 }
  0x15   : > { %s553_s29 = scalar_lea.vmem [#allocation2], %s1378_s28 }
  0x16   : > { %s711_s10 = scalar_select %p278_p4, 5, 2 }
  0x17   : > { %1453 = vmatpush3.bf16.msra.mxu0 %v1568_v3  ;;  %1477 = vmatpush3.bf16.msra.mxu1 %v1730_v9  ;;  %s787_s13 = scalar_select %p278_p4, 4, 3 }
  0x18   : > { %1462 = vmatprep.subr.bf16.mxu0 %v1571_v4  ;;  %1482 = vmatprep.subr.bf16.mxu1 %v1655_v1  ;;  %s1385_s11 = sshll.u32 %s711_s10, 3  ;;  %s272_s10 = scalar_lea.vmem %s1879_s4, %s1409_s27 }
  0x19   : > { %s713_s12 = scalar_lea.vmem [#allocation2], %s1385_s11  ;;  %s1388_s14 = sshll.u32 %s787_s13, 3 }
  0x1a   : > { %1455 = vmatmul.mubr.msk.bf16.vlgmr.msra.gmra.mrb[0].mxu0 %vm337_vm0, %v1570_v5  ;;  %1479 = vmatmul.mubr.bf16.vlgmr.msra.gmra.mrb[0].mxu1 %v1657_v12  ;;  %s789_s15 = scalar_lea.vmem [#allocation2], %s1388_s14  ;;  %s1344_s11 = sshll.u32 %s1705_s22, 3 }
  0x1b   : > { %1463 = vmatpush3.bf16.msra.mxu0 %v1571_v4  ;;  %1458 = vmatprep.mubr.msk.bf16.mxu0 %vm337_vm0, %v1572_v6  ;;  %s863_s16 = scalar_select %p278_p4, 3, 4 }
  0x1c   : > { %1464 = vmatprep.subr.bf16.mxu0 %v1574_v8  ;;  %1483 = vmatpush3.bf16.msra.mxu1 %v1727_v7  ;;  %s939_s21 = scalar_select %p278_p4, 2, 5 }
  0x1d   : > { %1486 = vmatprep.mubr.msk.bf16.mxu1 %vm1656_vm1, %v1655_v1  ;;  %1484 = vmatprep.subr.bf16.mxu1 %v1655_v1  ;;  %s1391_s17 = sshll.u32 %s863_s16, 3  ;;  %s276_s13 = scalar_lea.vmem %s1880_s5, %s1344_s11 }
  0x1e   : > { %s865_s20 = scalar_lea.vmem [#allocation2], %s1391_s17  ;;  %s1394_s23 = sshll.u32 %s939_s21, 3 }
  0x1f   : > { %1465 = vmatpush3.bf16.msra.mxu0 %v1574_v8  ;;  %s941_s24 = scalar_lea.vmem [#allocation2], %s1394_s23 }
  0x20   : > { %1506 = vmatprep.subr.bf16.mxu0 %v1655_v1  ;;  %1485 = vmatpush3.bf16.msra.mxu1 %v1730_v9  ;;  %s1015_s25 = scalar_select %p278_p4, 1, 6 }
  0x21   : > { %1490 = vmatprep.subr.bf16.mxu1 %v1655_v1 }
  0x22   : > { %1459 = vmatmul.mubr.msk.bf16.gmra.mrb[4].mxu0 %vm337_vm0, %v1573_v10  ;;  %s1397_s26 = sshll.u32 %s1015_s25, 3 }
  0x23   : > { %1466 = vmatprep.mubr.msk.bf16.mxu0 %vm337_vm0, %v1575_v11  ;;  %s1017_s28 = scalar_lea.vmem [#allocation2], %s1397_s26 }
  0x2a   : > { %1467 = vmatmul.mubr.msk.bf16.vlgmr.msra.gmra.mrb[0].mxu0 %vm337_vm0, %v1576_v13 }
  0x2b   : > { %1470 = vmatprep.mubr.msk.bf16.mxu0 %vm337_vm0, %v1577_v14  ;;  %1507 = vmatpush3.bf16.msra.mxu0 %v1727_v7 }
  0x2c   : > { %1508 = vmatprep.subr.bf16.mxu0 %v1655_v1 }
  0x2f   : > { %1509 = vmatpush3.bf16.msra.mxu0 %v1730_v9 }
  0x30   : > { %1522 = vmatprep.subr.bf16.mxu0 %v1655_v1 }
  0x32   : > { %1471 = vmatmul.mubr.msk.bf16.gmra.mrb[4].mxu0 %vm337_vm0, %v1578_v15 }
  0x33   : > { %1510 = vmatprep.mubr.msk.bf16.mxu0 %vm1656_vm1, %v1655_v1 }
  0xed   : > { %v604_v16 = vpop.f32.mrb[0].mxu1 }
  0xee   : > { %v1480_v17 = vpop.f32.mrb[1].mxu1 }
  0xef   : > { %v607_v18 = vpop.f32.mrb[2].mxu1 }
  0xf0   : > { %v1481_v19 = vpop.f32.mrb[3].mxu1 }
  0xfd   : > { %v1468_v21 = vpop.f32.mrb[0].mxu0 }
  0xfe   : > { %v533_v22 = vadd.f32 %v1468_v21, %v1377_v20  ;;  %v493_v23 = vpop.f32.mrb[1].mxu0 }
  0xff   : > { %v531_v24 = vadd.f32 %v1377_v20, %v493_v23  ;;  %v1469_v25 = vpop.f32.mrb[2].mxu0 }
 0x100   : > { %541 = vst [vmem:[#allocation2 + $0x10] sm:$0xff] %v533_v22  ;;  %v534_v26 = vadd.f32 %v1469_v25, %v1377_v20  ;;  %v496_v27 = vpop.f32.mrb[3].mxu0 }
 0x101   : > { %539 = vst [vmem:[#allocation2] sm:$0xff] %v531_v24  ;;  %v532_v28 = vadd.f32 %v1377_v20, %v496_v27 }
 0x102   : > { %542 = vst [vmem:[#allocation2 + $0x18] sm:$0xff] %v534_v26 }
 0x103   : > { %540 = vst [vmem:[#allocation2 + $0x8] sm:$0xff] %v532_v28 }
 0x105   : > { %v1472_v29 = vpop.f32.mrb[4].mxu0 }
 0x106   : > { %v537_v30 = vadd.f32 %v1472_v29, %v1377_v20  ;;  %v509_v31 = vpop.f32.mrb[5].mxu0 }
 0x107   : > { %v535_v32 = vadd.f32 %v1377_v20, %v509_v31  ;;  %v1473_v33 = vpop.f32.mrb[6].mxu0 }
 0x108   : > { %545 = vst [vmem:[#allocation2 + $0x30] sm:$0xff] %v537_v30  ;;  %v538_v34 = vadd.f32 %v1473_v33, %v1377_v20  ;;  %v512_v35 = vpop.f32.mrb[7].mxu0 }
 0x109   : > { %543 = vst [vmem:[#allocation2 + $0x20] sm:$0xff] %v535_v32  ;;  %v536_v36 = vadd.f32 %v1377_v20, %v512_v35 }
 0x10a   : > { %546 = vst [vmem:[#allocation2 + $0x38] sm:$0xff] %v538_v34 }
 0x10b   : > { %544 = vst [vmem:[#allocation2 + $0x28] sm:$0xff] %v536_v36 }
 0x112   : > { %v554_v37 = vld [vmem:[%s553_s29] sm:$0xff]  ;;  %s1091_s29 = scalar_select %p278_p4, 0, 7 }
 0x113   : > { %v610_v38 = vadd.f32 %v604_v16, %v554_v37  ;;  %v638_v54 = vld [vmem:[%s637_s9] sm:$0xff] }
 0x114   : > { %v714_v14 = vld [vmem:[%s713_s12] sm:$0xff]  ;;  %s1400_s7 = sshll.u32 %s1091_s29, 3 }
 0x115   : > { %1583 = vtanh.f32 %v610_v38  ;;  %v1381_v40 = vmul.f32 -1.442695, %v610_v38  ;;  %v790_v35 = vld [vmem:[%s789_s15] sm:$0xff]  ;;  %s1093_s8 = scalar_lea.vmem [#allocation2], %s1400_s7 }
 0x117   : > { %1585 = vpow2.f32 %v1381_v40 }
 0x11f   : > { %v1584_v39 = vpop.eup %1583 }
 0x120   : > { %620 = vrot.lane.b32.xlu0 %v1584_v39, %s1658_s30 }
 0x121   : > { %v1586_v41 = vpop.eup %1585 }
 0x122   : > { %v614_v42 = vadd.f32 1.0, %v1586_v41 }
 0x124   : > { %1587 = vrcp.f32 %v614_v42 }
 0x12e   : > { %v1588_v43 = vpop.eup %1587 }
 0x12f   : > { %v618_v46 = vmul.f32 0.0, %v1588_v43 }
 0x192   : > { %v621_v44 = vpop.permute.xlu0 %620 }
 0x193   : > { %v623_v45 = vmul.f32 %v1588_v43, %v621_v44 }
 0x195   : > { %625 = vrot.lane.b32.xlu0 %v623_v45, %s1658_s30 }
 0x207   : > { %v626_v47 = vpop.permute.xlu0 %625 }
 0x208   : > { %v628_v48 = vadd.f32 %v626_v47, %v618_v46 }
 0x20a   : > { %1589 = vtanh.f32 %v628_v48 }
 0x214   : > { %v1590_v49 = vpop.eup %1589 }
 0x215   : > { %631 = vrot.lane.b32.xlu1 %v1590_v49, %s1658_s30 }
 0x287   : > { %v632_v50 = vpop.permute.xlu1 %631 }
 0x288   : > { %v634_v51 = vmul.f32 %v1588_v43, %v632_v50 }
 0x28a   : > { %v639_v52 = vpack.c.bf16 %v634_v51, %v634_v51 }
 0x28c   : > { %641 = vrot.lane.b32.xlu1 %v639_v52, %s1659_s6 }
 0x2fe   : > { %v642_v53 = vpop.permute.xlu1 %641 }
 0x2ff   : > { %1487 = vmatmul.mubr.msk.bf16.vlgmr.msra.gmra.mrb[4].mxu1 %vm337_vm0, %v642_v53 }
 0x300   : > { %1491 = vmatpush3.bf16.msra.mxu1 %v1727_v7  ;;  %1494 = vmatprep.mubr.msk.bf16.mxu1 %vm1656_vm1, %v1655_v1 }
 0x301   : > { %1492 = vmatprep.subr.bf16.mxu1 %v1655_v1 }
 0x304   : > { %1493 = vmatpush3.bf16.msra.mxu1 %v1730_v9 }
 0x305   : > { %1498 = vmatprep.subr.bf16.mxu1 %v1655_v1 }
 0x3d2   : > { %v680_v55 = vpop.f32.mrb[4].mxu1 }
 0x3d3   : > { %v686_v56 = vadd.f32 %v680_v55, %v638_v54  ;;  %v1488_v57 = vpop.f32.mrb[5].mxu1 }
 0x3d4   : > { %v683_v58 = vpop.f32.mrb[6].mxu1 }
 0x3d5   : > { %1591 = vtanh.f32 %v686_v56  ;;  %v1489_v59 = vpop.f32.mrb[7].mxu1  ;;  %v1384_v61 = vmul.f32 -1.442695, %v686_v56  ;;  %v866_v56 = vld [vmem:[%s865_s20] sm:$0xff] }
 0x3d7   : > { %1593 = vpow2.f32 %v1384_v61 }
 0x3df   : > { %v1592_v60 = vpop.eup %1591 }
 0x3e0   : > { %696 = vrot.lane.b32.xlu0 %v1592_v60, %s1658_s30 }
 0x3e1   : > { %v1594_v62 = vpop.eup %1593 }
 0x3e2   : > { %v690_v63 = vadd.f32 1.0, %v1594_v62 }
 0x3e4   : > { %1595 = vrcp.f32 %v690_v63 }
 0x3ee   : > { %v1596_v0 = vpop.eup %1595 }
 0x3ef   : > { %v694_v4 = vmul.f32 %v1596_v0, %v628_v48 }
 0x452   : > { %v697_v2 = vpop.permute.xlu0 %696 }
 0x453   : > { %v699_v3 = vmul.f32 %v1596_v0, %v697_v2 }
 0x455   : > { %701 = vrot.lane.b32.xlu1 %v699_v3, %s1658_s30 }
 0x4c7   : > { %v702_v5 = vpop.permute.xlu1 %701 }
 0x4c8   : > { %v704_v6 = vadd.f32 %v702_v5, %v694_v4 }
 0x4ca   : > { %1597 = vtanh.f32 %v704_v6 }
 0x4d4   : > { %v1598_v8 = vpop.eup %1597 }
 0x4d5   : > { %707 = vrot.lane.b32.xlu0 %v1598_v8, %s1658_s30 }
 0x547   : > { %v708_v10 = vpop.permute.xlu0 %707 }
 0x548   : > { %v710_v11 = vmul.f32 %v1596_v0, %v708_v10 }
 0x54a   : > { %v715_v12 = vpack.c.bf16 %v710_v11, %v710_v11 }
 0x54c   : > { %717 = vrot.lane.b32.xlu1 %v715_v12, %s1659_s6 }
 0x5be   : > { %v718_v13 = vpop.permute.xlu1 %717 }
 0x5bf   : > { %1495 = vmatmul.mubr.msk.bf16.vlgmr.msra.gmra.mrb[8].mxu1 %vm337_vm0, %v718_v13 }
 0x5c0   : > { %1499 = vmatpush3.bf16.msra.mxu1 %v1727_v7  ;;  %1502 = vmatprep.mubr.msk.bf16.mxu1 %vm1656_vm1, %v1655_v1 }
 0x5c1   : > { %1500 = vmatprep.subr.bf16.mxu1 %v1655_v1 }
 0x5c4   : > { %1501 = vmatpush3.bf16.msra.mxu1 %v1730_v9 }
 0x5c5   : > { %1514 = vmatprep.subr.bf16.mxu1 %v1655_v1 }
 0x692   : > { %v756_v15 = vpop.f32.mrb[8].mxu1 }
 0x693   : > { %v762_v16 = vadd.f32 %v756_v15, %v714_v14  ;;  %v1496_v17 = vpop.f32.mrb[9].mxu1 }
 0x694   : > { %v759_v18 = vpop.f32.mrb[10].mxu1 }
 0x695   : > { %1599 = vtanh.f32 %v762_v16  ;;  %v1497_v19 = vpop.f32.mrb[11].mxu1  ;;  %v1387_v21 = vmul.f32 -1.442695, %v762_v16  ;;  %v942_v16 = vld [vmem:[%s941_s24] sm:$0xff] }
 0x697   : > { %1601 = vpow2.f32 %v1387_v21 }
 0x69f   : > { %v1600_v20 = vpop.eup %1599 }
 0x6a0   : > { %772 = vrot.lane.b32.xlu0 %v1600_v20, %s1658_s30 }
 0x6a1   : > { %v1602_v22 = vpop.eup %1601 }
 0x6a2   : > { %v766_v23 = vadd.f32 1.0, %v1602_v22 }
 0x6a4   : > { %1603 = vrcp.f32 %v766_v23 }
 0x6ae   : > { %v1604_v24 = vpop.eup %1603 }
 0x6af   : > { %v770_v27 = vmul.f32 %v1604_v24, %v704_v6 }
 0x712   : > { %v773_v25 = vpop.permute.xlu0 %772 }
 0x713   : > { %v775_v26 = vmul.f32 %v1604_v24, %v773_v25 }
 0x715   : > { %777 = vrot.lane.b32.xlu1 %v775_v26, %s1658_s30 }
 0x787   : > { %v778_v28 = vpop.permute.xlu1 %777 }
 0x788   : > { %v780_v29 = vadd.f32 %v778_v28, %v770_v27 }
 0x78a   : > { %1605 = vtanh.f32 %v780_v29 }
 0x794   : > { %v1606_v30 = vpop.eup %1605 }
 0x795   : > { %783 = vrot.lane.b32.xlu0 %v1606_v30, %s1658_s30 }
 0x807   : > { %v784_v31 = vpop.permute.xlu0 %783 }
 0x808   : > { %v786_v32 = vmul.f32 %v1604_v24, %v784_v31 }
 0x80a   : > { %v791_v33 = vpack.c.bf16 %v786_v32, %v786_v32 }
 0x80c   : > { %793 = vrot.lane.b32.xlu1 %v791_v33, %s1659_s6 }
 0x87e   : > { %v794_v34 = vpop.permute.xlu1 %793 }
 0x87f   : > { %1503 = vmatmul.mubr.msk.bf16.vlgmr.msra.gmra.mrb[12].mxu1 %vm337_vm0, %v794_v34 }
 0x880   : > { %1515 = vmatpush3.bf16.msra.mxu1 %v1727_v7  ;;  %1518 = vmatprep.mubr.msk.bf16.mxu1 %vm1656_vm1, %v1655_v1 }
 0x881   : > { %1516 = vmatprep.subr.bf16.mxu1 %v1655_v1 }
 0x884   : > { %1517 = vmatpush3.bf16.msra.mxu1 %v1730_v9 }
 0x885   : > { %1530 = vmatprep.subr.bf16.mxu1 %v1655_v1 }
 0x952   : > { %v832_v36 = vpop.f32.mrb[12].mxu1 }
 0x953   : > { %v838_v37 = vadd.f32 %v832_v36, %v790_v35  ;;  %v1504_v38 = vpop.f32.mrb[13].mxu1  ;;  %v1018_v35 = vld [vmem:[%s1017_s28] sm:$0xff] }
 0x954   : > { %v835_v39 = vpop.f32.mrb[14].mxu1 }
 0x955   : > { %1607 = vtanh.f32 %v838_v37  ;;  %v1505_v40 = vpop.f32.mrb[15].mxu1  ;;  %v1390_v42 = vmul.f32 -1.442695, %v838_v37 }
 0x957   : > { %1609 = vpow2.f32 %v1390_v42 }
 0x95f   : > { %v1608_v41 = vpop.eup %1607 }
 0x960   : > { %848 = vrot.lane.b32.xlu0 %v1608_v41, %s1658_s30 }
 0x961   : > { %v1610_v43 = vpop.eup %1609 }
 0x962   : > { %v842_v44 = vadd.f32 1.0, %v1610_v43 }
 0x964   : > { %1611 = vrcp.f32 %v842_v44 }
 0x96e   : > { %v1612_v45 = vpop.eup %1611 }
 0x96f   : > { %v846_v48 = vmul.f32 %v1612_v45, %v780_v29 }
 0x9d2   : > { %v849_v46 = vpop.permute.xlu0 %848 }
 0x9d3   : > { %v851_v47 = vmul.f32 %v1612_v45, %v849_v46 }
 0x9d5   : > { %853 = vrot.lane.b32.xlu1 %v851_v47, %s1658_s30 }
 0xa47   : > { %v854_v49 = vpop.permute.xlu1 %853 }
 0xa48   : > { %v856_v50 = vadd.f32 %v854_v49, %v846_v48 }
 0xa4a   : > { %1613 = vtanh.f32 %v856_v50 }
 0xa54   : > { %v1614_v51 = vpop.eup %1613 }
 0xa55   : > { %859 = vrot.lane.b32.xlu0 %v1614_v51, %s1658_s30 }
 0xac7   : > { %v860_v52 = vpop.permute.xlu0 %859 }
 0xac8   : > { %v862_v53 = vmul.f32 %v1612_v45, %v860_v52 }
 0xaca   : > { %v867_v54 = vpack.c.bf16 %v862_v53, %v862_v53 }
 0xacc   : > { %869 = vrot.lane.b32.xlu1 %v867_v54, %s1659_s6 }
 0xb3e   : > { %v870_v55 = vpop.permute.xlu1 %869 }
 0xb3f   : > { %1511 = vmatmul.mubr.msk.bf16.vlgmr.msra.gmra.mrb[8].mxu0 %vm337_vm0, %v870_v55 }
 0xb40   : > { %1523 = vmatpush3.bf16.msra.mxu0 %v1727_v7  ;;  %1526 = vmatprep.mubr.msk.bf16.mxu0 %vm1656_vm1, %v1655_v1 }
 0xb41   : > { %1524 = vmatprep.subr.bf16.mxu0 %v1655_v1 }
 0xb44   : > { %1525 = vmatpush3.bf16.msra.mxu0 %v1730_v9 }
 0xb45   : > { %1538 = vmatprep.subr.bf16.mxu0 %v1655_v1 }
 0xc12   : > { %v908_v57 = vpop.f32.mrb[8].mxu0 }
 0xc13   : > { %v914_v58 = vadd.f32 %v908_v57, %v866_v56  ;;  %v1512_v59 = vpop.f32.mrb[9].mxu0  ;;  %v1094_v56 = vld [vmem:[%s1093_s8] sm:$0xff] }
 0xc14   : > { %v911_v60 = vpop.f32.mrb[10].mxu0 }
 0xc15   : > { %1615 = vtanh.f32 %v914_v58  ;;  %v1513_v61 = vpop.f32.mrb[11].mxu0  ;;  %v1393_v63 = vmul.f32 -1.442695, %v914_v58 }
 0xc17   : > { %1617 = vpow2.f32 %v1393_v63 }
 0xc1f   : > { %v1616_v62 = vpop.eup %1615 }
 0xc20   : > { %924 = vrot.lane.b32.xlu0 %v1616_v62, %s1658_s30 }
 0xc21   : > { %v1618_v0 = vpop.eup %1617 }
 0xc22   : > { %v918_v2 = vadd.f32 1.0, %v1618_v0 }
 0xc24   : > { %1619 = vrcp.f32 %v918_v2 }
 0xc2e   : > { %v1620_v3 = vpop.eup %1619 }
 0xc2f   : > { %v922_v6 = vmul.f32 %v1620_v3, %v856_v50 }
 0xc92   : > { %v925_v4 = vpop.permute.xlu0 %924 }
 0xc93   : > { %v927_v5 = vmul.f32 %v1620_v3, %v925_v4 }
 0xc95   : > { %929 = vrot.lane.b32.xlu1 %v927_v5, %s1658_s30 }
 0xd07   : > { %v930_v8 = vpop.permute.xlu1 %929 }
 0xd08   : > { %v932_v10 = vadd.f32 %v930_v8, %v922_v6 }
 0xd0a   : > { %1621 = vtanh.f32 %v932_v10 }
 0xd14   : > { %v1622_v11 = vpop.eup %1621 }
 0xd15   : > { %935 = vrot.lane.b32.xlu0 %v1622_v11, %s1658_s30  ;;  %v1581_v11 = vld [vmem:[%s272_s10] sm:$0xff]  }
 0xd87   : > { %v936_v12 = vpop.permute.xlu0 %935 }
 0xd88   : > { %v938_v13 = vmul.f32 %v1620_v3, %v936_v12  ;;  %v1582_v12 = vld [vmem:[%s272_s10 + $0x8] sm:$0xff]  }
 0xd8a   : > { %v943_v14 = vpack.c.bf16 %v938_v13, %v938_v13 }
 0xd8c   : > { %945 = vrot.lane.b32.xlu1 %v943_v14, %s1659_s6 }
 0xdfe   : > { %v946_v15 = vpop.permute.xlu1 %945 }
 0xdff   : > { %1519 = vmatmul.mubr.msk.bf16.vlgmr.msra.gmra.mrb[16].mxu1 %vm337_vm0, %v946_v15 }
 0xe00   : > { %1531 = vmatpush3.bf16.msra.mxu1 %v1727_v7  ;;  %1534 = vmatprep.mubr.msk.bf16.mxu1 %vm1656_vm1, %v1655_v1 }
 0xe01   : > { %1532 = vmatprep.subr.bf16.mxu1 %v1655_v1 }
 0xe04   : > { %1533 = vmatpush3.bf16.msra.mxu1 %v1730_v9 }
 0xed2   : > { %v984_v17 = vpop.f32.mrb[16].mxu1 }
 0xed3   : > { %v990_v18 = vadd.f32 %v984_v17, %v942_v16  ;;  %v1520_v19 = vpop.f32.mrb[17].mxu1 }
 0xed4   : > { %v987_v20 = vpop.f32.mrb[18].mxu1 }
 0xed5   : > { %1623 = vtanh.f32 %v990_v18  ;;  %v1521_v21 = vpop.f32.mrb[19].mxu1  ;;  %v1396_v7 = vmul.f32 -1.442695, %v990_v18 }
 0xed7   : > { %1625 = vpow2.f32 %v1396_v7 }
 0xedf   : > { %v1624_v22 = vpop.eup %1623 }
 0xee0   : > { %1000 = vrot.lane.b32.xlu0 %v1624_v22, %s1658_s30 }
 0xee1   : > { %v1626_v23 = vpop.eup %1625 }
 0xee2   : > { %v994_v24 = vadd.f32 1.0, %v1626_v23 }
 0xee4   : > { %1627 = vrcp.f32 %v994_v24 }
 0xeee   : > { %v1628_v9 = vpop.eup %1627 }
 0xeef   : > { %v998_v27 = vmul.f32 %v1628_v9, %v932_v10 }
 0xf52   : > { %v1001_v25 = vpop.permute.xlu0 %1000 }
 0xf53   : > { %v1003_v26 = vmul.f32 %v1628_v9, %v1001_v25 }
 0xf55   : > { %1005 = vrot.lane.b32.xlu1 %v1003_v26, %s1658_s30 }
 0xfc7   : > { %v1006_v28 = vpop.permute.xlu1 %1005 }
 0xfc8   : > { %v1008_v29 = vadd.f32 %v1006_v28, %v998_v27 }
 0xfca   : > { %1629 = vtanh.f32 %v1008_v29 }
 0xfd4   : > { %v1630_v30 = vpop.eup %1629 }
 0xfd5   : > { %1011 = vrot.lane.b32.xlu0 %v1630_v30, %s1658_s30 }
0x1047   : > { %v1012_v31 = vpop.permute.xlu0 %1011 }
0x1048   : > { %v1014_v32 = vmul.f32 %v1628_v9, %v1012_v31 }
0x104a   : > { %v1019_v33 = vpack.c.bf16 %v1014_v32, %v1014_v32 }
0x104c   : > { %1021 = vrot.lane.b32.xlu1 %v1019_v33, %s1659_s6 }
0x10be   : > { %v1022_v34 = vpop.permute.xlu1 %1021 }
0x10bf   : > { %1527 = vmatmul.mubr.msk.bf16.vlgmr.msra.gmra.mrb[12].mxu0 %vm337_vm0, %v1022_v34 }
0x10c0   : > { %1542 = vmatprep.mubr.msk.bf16.mxu0 %vm1656_vm1, %v1655_v1  ;;  %1539 = vmatpush3.bf16.msra.mxu0 %v1581_v11 }
0x10c1   : > { %1540 = vmatprep.subr.bf16.mxu0 %v1655_v1 }
0x10c4   : > { %1541 = vmatpush3.bf16.msra.mxu0 %v1582_v12 }
0x1192   : > { %v1060_v36 = vpop.f32.mrb[12].mxu0 }
0x1193   : > { %v1066_v37 = vadd.f32 %v1060_v36, %v1018_v35  ;;  %v1528_v38 = vpop.f32.mrb[13].mxu0 }
0x1194   : > { %v1063_v39 = vpop.f32.mrb[14].mxu0 }
0x1195   : > { %1631 = vtanh.f32 %v1066_v37  ;;  %v1529_v40 = vpop.f32.mrb[15].mxu0  ;;  %v1399_v42 = vmul.f32 -1.442695, %v1066_v37 }
0x1197   : > { %1633 = vpow2.f32 %v1399_v42 }
0x119f   : > { %v1632_v41 = vpop.eup %1631 }
0x11a0   : > { %1076 = vrot.lane.b32.xlu0 %v1632_v41, %s1658_s30 }
0x11a1   : > { %v1634_v43 = vpop.eup %1633 }
0x11a2   : > { %v1070_v44 = vadd.f32 1.0, %v1634_v43 }
0x11a4   : > { %1635 = vrcp.f32 %v1070_v44 }
0x11ae   : > { %v1636_v45 = vpop.eup %1635 }
0x11af   : > { %v1074_v48 = vmul.f32 %v1636_v45, %v1008_v29 }
0x1212   : > { %v1077_v46 = vpop.permute.xlu0 %1076 }
0x1213   : > { %v1079_v47 = vmul.f32 %v1636_v45, %v1077_v46 }
0x1215   : > { %1081 = vrot.lane.b32.xlu1 %v1079_v47, %s1658_s30 }
0x1287   : > { %v1082_v49 = vpop.permute.xlu1 %1081 }
0x1288   : > { %v1084_v50 = vadd.f32 %v1082_v49, %v1074_v48 }
0x128a   : > { %1637 = vtanh.f32 %v1084_v50 }
0x1294   : > { %v1638_v51 = vpop.eup %1637 }
0x1295   : > { %1087 = vrot.lane.b32.xlu0 %v1638_v51, %s1658_s30 }
0x1307   : > { %v1088_v52 = vpop.permute.xlu0 %1087 }
0x1308   : > { %v1090_v53 = vmul.f32 %v1636_v45, %v1088_v52 }
0x130a   : > { %v1095_v54 = vpack.c.bf16 %v1090_v53, %v1090_v53 }
0x130c   : > { %1097 = vrot.lane.b32.xlu1 %v1095_v54, %s1659_s6 }
0x137e   : > { %v1098_v55 = vpop.permute.xlu1 %1097 }
0x137f   : > { %1535 = vmatmul.mubr.msk.bf16.vlgmr.msra.gmra.mrb[20].mxu1 %vm337_vm0, %v1098_v55 }
0x1452   : > { %v1136_v57 = vpop.f32.mrb[20].mxu1 }
0x1453   : > { %v1142_v58 = vadd.f32 %v1136_v57, %v1094_v56  ;;  %v1536_v59 = vpop.f32.mrb[21].mxu1 }
0x1454   : > { %v1139_v60 = vpop.f32.mrb[22].mxu1 }
0x1455   : > { %1639 = vtanh.f32 %v1142_v58  ;;  %v1537_v61 = vpop.f32.mrb[23].mxu1  ;;  %v1402_v63 = vmul.f32 -1.442695, %v1142_v58 }
0x1457   : > { %1641 = vpow2.f32 %v1402_v63 }
0x145f   : > { %v1640_v62 = vpop.eup %1639 }
0x1460   : > { %1152 = vrot.lane.b32.xlu0 %v1640_v62, %s1658_s30 }
0x1461   : > { %v1642_v0 = vpop.eup %1641 }
0x1462   : > { %v1146_v2 = vadd.f32 1.0, %v1642_v0 }
0x1464   : > { %1643 = vrcp.f32 %v1146_v2 }
0x146e   : > { %v1644_v3 = vpop.eup %1643 }
0x146f   : > { %v1150_v6 = vmul.f32 %v1644_v3, %v1084_v50 }
0x14d2   : > { %v1153_v4 = vpop.permute.xlu0 %1152 }
0x14d3   : > { %v1155_v5 = vmul.f32 %v1644_v3, %v1153_v4 }
0x14d5   : > { %1157 = vrot.lane.b32.xlu1 %v1155_v5, %s1658_s30 }
0x1547   : > { %v1158_v8 = vpop.permute.xlu1 %1157 }
0x1548   : > { %v1160_v10 = vadd.f32 %v1158_v8, %v1150_v6 }
0x154a   : > { %1645 = vtanh.f32 %v1160_v10 }
0x1554   : > { %v1646_v13 = vpop.eup %1645 }
0x1555   : > { %1163 = vrot.lane.b32.xlu0 %v1646_v13, %s1658_s30 }
0x15c7   : > { %v1164_v14 = vpop.permute.xlu0 %1163 }
0x15c8   : > { %v1166_v15 = vmul.f32 %v1644_v3, %v1164_v14 }
0x15ca   : > { %v1167_v16 = vpack.c.bf16 %v1166_v15, %v1166_v15 }
0x15cc   : > { %1173 = vrot.lane.b32.xlu1 %v1167_v16, %s1659_s6 }
0x163e   : > { %v1174_v17 = vpop.permute.xlu1 %1173 }
0x163f   : > { %1543 = vmatmul.mubr.msk.bf16.vlgmr.msra.gmra.mrb[16].mxu0 %vm337_vm0, %v1174_v17 }
0x1712   : > { %v1224_v18 = vpop.f32.mrb[16].mxu0 }
0x1713   : > { %1230 = vst [vmem:[%s276_s13] sm:$0xff] %v1224_v18  ;;  %v1544_v1 = vpop.f32.mrb[17].mxu0 }
0x1714   : > { %v1227_v19 = vpop.f32.mrb[18].mxu0 }
0x1715   : > { %v1545_v20 = vpop.f32.mrb[19].mxu0 }
0x1716 PF: > { %s15_s18 = sadd.s32 1, %s1653_s18  }
0x1717   : > { %p12_p5 = scmp.ge.s32.totalorder %s15_s18, 4  }
0x1719   :  { %14 = sbr.rel (!%p12_p5) target bundleno = 1 (0x1), region = 89 }

</bundles_post_ra>
